<compile_context>
chip_gen: v5e
topology: v5e:2x2
jax: 0.10.0
libtpu: 0.0.40
codegen_flags: <defaults>
</compile_context>

<pallas_src>
import functools

import jax
import jax.numpy as jnp
from jax import lax
from jax.experimental import pallas as pl
from jax.experimental.pallas import tpu as pltpu


# ----------------------------------------------------------------------------
# Fused kernel: num_layers LSTM layers (wavefront) + linear head, single pallas_call
# ----------------------------------------------------------------------------
def _fused_lstm_kernel(num_layers, T, H, x_ref, *refs):
    """Argument layout (after statically bound num_layers, T, H):

    inputs : x_ref (T*Bp, Din)   time-major, batch-padded, flattened input (f32)
             per layer: wih (Din_l, 4H), whh (H, 4H), bias (1, 4H)   (f32, gate order i,f,o,g)
             w_out (1, H), b_out (1, 1)
    outputs: out_ref (Bp, 1)
    """
    n_w = 3 * num_layers
    layer_refs = refs[:n_w]
    w_out_ref = refs[n_w]
    b_out_ref = refs[n_w + 1]
    out_ref = refs[n_w + 2]

    Bp = x_ref.shape[0] // T

    # One-time bf16 copies of the MXU operands (off the serial chain; traced once).
    wih = [layer_refs[3 * l][...].astype(jnp.bfloat16) for l in range(num_layers)]
    whh = [layer_refs[3 * l + 1][...].astype(jnp.bfloat16) for l in range(num_layers)]
    bias = [layer_refs[3 * l + 2][...] for l in range(num_layers)]          # f32

    # Hoisted layer-0 input projection: one GEMM for all T steps, bias folded in.
    gx0 = (
        jnp.dot(x_ref[...].astype(jnp.bfloat16), wih[0],
                preferred_element_type=jnp.float32)
        + bias[0]
    )                                                                       # (T*Bp, 4H) f32

    h = [jnp.zeros((Bp, H), jnp.float32) for _ in range(num_layers)]
    c = [jnp.zeros((Bp, H), jnp.float32) for _ in range(num_layers)]

    def cell(gates, c_prev):
        # Gate column order (permuted at prep time): i, f, o, g.
        # One sigmoid over the dense 4H=128-lane gates vreg; tanh only on the g slice.
        sg = jax.nn.sigmoid(gates)
        i_g = sg[:, 0:H]
        f_g = sg[:, H:2 * H]
        o_g = sg[:, 2 * H:3 * H]
        g_g = jnp.tanh(gates[:, 3 * H:4 * H])
        c_new = f_g * c_prev + i_g * g_g
        h_new = o_g * jnp.tanh(c_new)
        return h_new, c_new

    # Wavefront over the (layer, time) grid: diagonal d runs layer l at step t = d - l.
    # Decreasing-l order lets layer l read h[l-1] (still holding step d-l) before layer
    # l-1 overwrites it, so no copies / scratch are needed.  Steps within a diagonal are
    # mutually independent -> their MXU pushes and EUP calls overlap.
    for d in range(T + num_layers - 1):
        for l in reversed(range(num_layers)):
            t = d - l
            if 0 <= t < T:
                if l == 0:
                    gates = gx0[t * Bp:(t + 1) * Bp, :] + jnp.dot(
                        h[0].astype(jnp.bfloat16), whh[0],
                        preferred_element_type=jnp.float32)
                else:
                    gates = (
                        bias[l]
                        + jnp.dot(h[l - 1].astype(jnp.bfloat16), wih[l],
                                  preferred_element_type=jnp.float32)
                        + jnp.dot(h[l].astype(jnp.bfloat16), whh[l],
                                  preferred_element_type=jnp.float32)
                    )
                h[l], c[l] = cell(gates, c[l])
        # inter-layer dropout: identity at inference time

    # Linear head fused in: VPU multiply + lane reduction (avoids an N=1 MXU matmul).
    out_ref[...] = (
        jnp.sum(h[num_layers - 1] * w_out_ref[...], axis=-1, keepdims=True)
        + b_out_ref[...]
    )


# ----------------------------------------------------------------------------
# Wrapper
# ----------------------------------------------------------------------------
def _permute_gates_ifgo_to_ifog(w):
    """Reorder the 4H gate-blocked leading axis from PyTorch (i,f,g,o) to (i,f,o,g)."""
    i, f, g, o = jnp.split(w, 4, axis=0)
    return jnp.concatenate([i, f, o, g], axis=0)


def lstm_model_forward(x, params):
    """x: (B, T, input_size) -> (B, 1); matches LSTMModel.forward (eval mode)."""
    B, T, Din = x.shape
    H = params["lstm"][0]["w_hh"].shape[1]
    num_layers = len(params["lstm"])

    # Pad batch to a full f32 sublane group (8); flatten to a 2D time-major slab so the
    # kernel never reshapes loaded values.
    Bp = max(8, -(-B // 8) * 8)
    xt = jnp.transpose(x.astype(jnp.float32), (1, 0, 2))            # (T, B, Din)
    xt = jnp.pad(xt, ((0, 0), (0, Bp - B), (0, 0))).reshape(T * Bp, Din)

    flat = [xt]
    for layer in params["lstm"]:
        wih_t = _permute_gates_ifgo_to_ifog(layer["w_ih"]).T        # (Din_l, 4H)
        whh_t = _permute_gates_ifgo_to_ifog(layer["w_hh"]).T        # (H, 4H)
        b = _permute_gates_ifgo_to_ifog(layer["b_ih"] + layer["b_hh"]).reshape(1, 4 * H)
        flat += [wih_t, whh_t, b]
    flat += [params["w_out"].reshape(1, H).astype(jnp.float32),
             params["b_out"].reshape(1, 1).astype(jnp.float32)]

    vmem = pl.BlockSpec(memory_space=pltpu.MemorySpace.VMEM)
    out = pl.pallas_call(
        functools.partial(_fused_lstm_kernel, num_layers, T, H),
        out_shape=jax.ShapeDtypeStruct((Bp, 1), jnp.float32),
        in_specs=[vmem] * len(flat),
        out_specs=vmem,
    )(*flat)
    return out[:B]                                                   # drop padded rows


# ----------------------------------------------------------------------------
# Pure-JAX reference (f32, PyTorch gate order) for correctness verification
# ----------------------------------------------------------------------------
def _reference_forward(x, params):
    h_seq = x.astype(jnp.float32)
    H = params["lstm"][0]["w_hh"].shape[1]
    for layer in params["lstm"]:
        wih, whh = layer["w_ih"].T, layer["w_hh"].T
        b = layer["b_ih"] + layer["b_hh"]
        B = h_seq.shape[0]

        def step(carry, x_t):
            h, c = carry
            gates = x_t @ wih + h @ whh + b
            i = jax.nn.sigmoid(gates[:, 0:H])
            f = jax.nn.sigmoid(gates[:, H:2 * H])
            g = jnp.tanh(gates[:, 2 * H:3 * H])
            o = jax.nn.sigmoid(gates[:, 3 * H:4 * H])
            c = f * c + i * g
            h = o * jnp.tanh(c)
            return (h, c), h

        init = (jnp.zeros((B, H), jnp.float32), jnp.zeros((B, H), jnp.float32))
        _, hs = lax.scan(step, init, jnp.transpose(h_seq, (1, 0, 2)))
        h_seq = jnp.transpose(hs, (1, 0, 2))
    return h_seq[:, -1, :] @ params["w_out"].T + params["b_out"]


# ----------------------------------------------------------------------------
# Deterministic parameter initialization (same shapes / layout as nn.LSTM / nn.Linear)
# ----------------------------------------------------------------------------
def init_params(key, input_size, hidden_size, num_layers):
    bound = 1.0 / (hidden_size ** 0.5)
    layers = []
    for layer_idx in range(num_layers):
        din = input_size if layer_idx == 0 else hidden_size
        key, k1, k2, k3, k4 = jax.random.split(key, 5)
        layers.append({
            "w_ih": jax.random.uniform(k1, (4 * hidden_size, din), jnp.float32, -bound, bound),
            "w_hh": jax.random.uniform(k2, (4 * hidden_size, hidden_size), jnp.float32, -bound, bound),
            "b_ih": jax.random.uniform(k3, (4 * hidden_size,), jnp.float32, -bound, bound),
            "b_hh": jax.random.uniform(k4, (4 * hidden_size,), jnp.float32, -bound, bound),
        })
    key, k5, k6 = jax.random.split(key, 3)
    w_out = jax.random.uniform(k5, (1, hidden_size), jnp.float32, -bound, bound)
    b_out = jax.random.uniform(k6, (1,), jnp.float32, -bound, bound)
    return {"lstm": layers, "w_out": w_out, "b_out": b_out}


# ----------------------------------------------------------------------------
# Main
# ----------------------------------------------------------------------------
if __name__ == "__main__":
    INPUT_SIZE = 4
    HIDDEN_SIZE = 32
    NUM_LAYERS = 2
    BATCH = 2
    SEQ_LEN = 8

    key = jax.random.PRNGKey(0)
    key, kx = jax.random.split(key)
    x = jax.random.normal(kx, (BATCH, SEQ_LEN, INPUT_SIZE), jnp.float32)

    params = init_params(key, INPUT_SIZE, HIDDEN_SIZE, NUM_LAYERS)

    fwd = jax.jit(lstm_model_forward)
    out = jax.block_until_ready(fwd(x, params))
    assert out.shape == (BATCH, 1), out.shape
    assert out.dtype == jnp.float32, out.dtype

    # Tolerance loosened vs. the pure-f32 kernel because matmul operands are bf16
    # (states/activations remain f32); error stays well under 1e-2 at these sizes.
    ref = jax.block_until_ready(_reference_forward(x, params))
    assert jnp.allclose(out, ref, atol=1e-2, rtol=1e-2), (out, ref)

    print("KERNEL_OK")
</pallas_src>

<mosaic_0001>
module attributes {stable_mosaic.version = 11 : i64} {
  func.func @_fused_lstm_kernel(%arg0: memref<64x4xf32, #tpu.memory_space<vmem>>, %arg1: memref<4x128xf32, #tpu.memory_space<vmem>>, %arg2: memref<32x128xf32, #tpu.memory_space<vmem>>, %arg3: memref<1x128xf32, #tpu.memory_space<vmem>>, %arg4: memref<32x128xf32, #tpu.memory_space<vmem>>, %arg5: memref<32x128xf32, #tpu.memory_space<vmem>>, %arg6: memref<1x128xf32, #tpu.memory_space<vmem>>, %arg7: memref<1x32xf32, #tpu.memory_space<vmem>>, %arg8: memref<1x1xf32, #tpu.memory_space<vmem>>, %arg9: memref<8x1xf32, #tpu.memory_space<vmem>>) attributes {dimension_semantics = [], scalar_prefetch = 0 : i64, scratch_operands = 0 : i64, tpu.core_type = #tpu.core_type<tc>} {
    %c0 = arith.constant 0 : index
    %c0_0 = arith.constant 0 : index
    %0 = vector.load %arg1[%c0, %c0_0] : memref<4x128xf32, #tpu.memory_space<vmem>>, vector<4x128xf32>
    %1 = arith.truncf %0 : vector<4x128xf32> to vector<4x128xbf16>
    %c0_1 = arith.constant 0 : index
    %c0_2 = arith.constant 0 : index
    %2 = vector.load %arg4[%c0_1, %c0_2] : memref<32x128xf32, #tpu.memory_space<vmem>>, vector<32x128xf32>
    %3 = arith.truncf %2 : vector<32x128xf32> to vector<32x128xbf16>
    %c0_3 = arith.constant 0 : index
    %c0_4 = arith.constant 0 : index
    %4 = vector.load %arg2[%c0_3, %c0_4] : memref<32x128xf32, #tpu.memory_space<vmem>>, vector<32x128xf32>
    %5 = arith.truncf %4 : vector<32x128xf32> to vector<32x128xbf16>
    %c0_5 = arith.constant 0 : index
    %c0_6 = arith.constant 0 : index
    %6 = vector.load %arg5[%c0_5, %c0_6] : memref<32x128xf32, #tpu.memory_space<vmem>>, vector<32x128xf32>
    %7 = arith.truncf %6 : vector<32x128xf32> to vector<32x128xbf16>
    %c0_7 = arith.constant 0 : index
    %c0_8 = arith.constant 0 : index
    %8 = vector.load %arg3[%c0_7, %c0_8] : memref<1x128xf32, #tpu.memory_space<vmem>>, vector<1x128xf32>
    %c0_9 = arith.constant 0 : index
    %c0_10 = arith.constant 0 : index
    %9 = vector.load %arg6[%c0_9, %c0_10] : memref<1x128xf32, #tpu.memory_space<vmem>>, vector<1x128xf32>
    %c0_11 = arith.constant 0 : index
    %c0_12 = arith.constant 0 : index
    %10 = vector.load %arg0[%c0_11, %c0_12] : memref<64x4xf32, #tpu.memory_space<vmem>>, vector<64x4xf32>
    %11 = arith.truncf %10 : vector<64x4xf32> to vector<64x4xbf16>
    %cst = arith.constant dense<0.000000e+00> : vector<64x128xf32>
    %12 = tpu.matmul %11, %1, %cst {dimension_numbers = #tpu.dot_dimension_numbers<[1], [0], [0], [1], [0, 0, 1, 1], [], []>} : vector<64x4xbf16>, vector<4x128xbf16>, vector<64x128xf32> -> vector<64x128xf32>
    %13 = vector.broadcast %8 : vector<1x128xf32> to vector<64x128xf32>
    %14 = arith.addf %12, %13 : vector<64x128xf32>
    %cst_13 = arith.constant 0.000000e+00 : f32
    %15 = vector.broadcast %cst_13 : f32 to vector<8x32xf32>
    %cst_14 = arith.constant 0.000000e+00 : f32
    %16 = vector.broadcast %cst_14 : f32 to vector<8x32xf32>
    %cst_15 = arith.constant 0.000000e+00 : f32
    %17 = vector.broadcast %cst_15 : f32 to vector<8x32xf32>
    %cst_16 = arith.constant 0.000000e+00 : f32
    %18 = vector.broadcast %cst_16 : f32 to vector<8x32xf32>
    %19 = vector.extract_strided_slice %14 {offsets = [0, 0], sizes = [8, 128], strides = [1, 1]} : vector<64x128xf32> to vector<8x128xf32>
    %20 = arith.truncf %15 : vector<8x32xf32> to vector<8x32xbf16>
    %cst_17 = arith.constant dense<0.000000e+00> : vector<8x128xf32>
    %21 = tpu.matmul %20, %5, %cst_17 {dimension_numbers = #tpu.dot_dimension_numbers<[1], [0], [0], [1], [0, 0, 1, 1], [], []>} : vector<8x32xbf16>, vector<32x128xbf16>, vector<8x128xf32> -> vector<8x128xf32>
    %22 = arith.addf %19, %21 : vector<8x128xf32>
    %23 = arith.negf %22 : vector<8x128xf32>
    %24 = math.exp %23 : vector<8x128xf32>
    %cst_18 = arith.constant 1.000000e+00 : f32
    %25 = vector.broadcast %cst_18 : f32 to vector<8x128xf32>
    %26 = arith.addf %25, %24 : vector<8x128xf32>
    %27 = arith.divf %25, %26 : vector<8x128xf32>
    %28 = vector.extract_strided_slice %27 {offsets = [0, 0], sizes = [8, 32], strides = [1, 1]} : vector<8x128xf32> to vector<8x32xf32>
    %29 = vector.extract_strided_slice %27 {offsets = [0, 32], sizes = [8, 32], strides = [1, 1]} : vector<8x128xf32> to vector<8x32xf32>
    %30 = vector.extract_strided_slice %27 {offsets = [0, 64], sizes = [8, 32], strides = [1, 1]} : vector<8x128xf32> to vector<8x32xf32>
    %31 = vector.extract_strided_slice %22 {offsets = [0, 96], sizes = [8, 32], strides = [1, 1]} : vector<8x128xf32> to vector<8x32xf32>
    %32 = math.tanh %31 : vector<8x32xf32>
    %33 = arith.mulf %29, %17 : vector<8x32xf32>
    %34 = arith.mulf %28, %32 : vector<8x32xf32>
    %35 = arith.addf %33, %34 : vector<8x32xf32>
    %36 = math.tanh %35 : vector<8x32xf32>
    %37 = arith.mulf %30, %36 : vector<8x32xf32>
    %38 = arith.truncf %37 : vector<8x32xf32> to vector<8x32xbf16>
    %cst_19 = arith.constant dense<0.000000e+00> : vector<8x128xf32>
    %39 = tpu.matmul %38, %3, %cst_19 {dimension_numbers = #tpu.dot_dimension_numbers<[1], [0], [0], [1], [0, 0, 1, 1], [], []>} : vector<8x32xbf16>, vector<32x128xbf16>, vector<8x128xf32> -> vector<8x128xf32>
    %40 = vector.broadcast %9 : vector<1x128xf32> to vector<8x128xf32>
    %41 = arith.addf %40, %39 : vector<8x128xf32>
    %42 = arith.truncf %16 : vector<8x32xf32> to vector<8x32xbf16>
    %cst_20 = arith.constant dense<0.000000e+00> : vector<8x128xf32>
    %43 = tpu.matmul %42, %7, %cst_20 {dimension_numbers = #tpu.dot_dimension_numbers<[1], [0], [0], [1], [0, 0, 1, 1], [], []>} : vector<8x32xbf16>, vector<32x128xbf16>, vector<8x128xf32> -> vector<8x128xf32>
    %44 = arith.addf %41, %43 : vector<8x128xf32>
    %45 = arith.negf %44 : vector<8x128xf32>
    %46 = math.exp %45 : vector<8x128xf32>
    %cst_21 = arith.constant 1.000000e+00 : f32
    %47 = vector.broadcast %cst_21 : f32 to vector<8x128xf32>
    %48 = arith.addf %47, %46 : vector<8x128xf32>
    %49 = arith.divf %47, %48 : vector<8x128xf32>
    %50 = vector.extract_strided_slice %49 {offsets = [0, 0], sizes = [8, 32], strides = [1, 1]} : vector<8x128xf32> to vector<8x32xf32>
    %51 = vector.extract_strided_slice %49 {offsets = [0, 32], sizes = [8, 32], strides = [1, 1]} : vector<8x128xf32> to vector<8x32xf32>
    %52 = vector.extract_strided_slice %49 {offsets = [0, 64], sizes = [8, 32], strides = [1, 1]} : vector<8x128xf32> to vector<8x32xf32>
    %53 = vector.extract_strided_slice %44 {offsets = [0, 96], sizes = [8, 32], strides = [1, 1]} : vector<8x128xf32> to vector<8x32xf32>
    %54 = math.tanh %53 : vector<8x32xf32>
    %55 = arith.mulf %51, %18 : vector<8x32xf32>
    %56 = arith.mulf %50, %54 : vector<8x32xf32>
    %57 = arith.addf %55, %56 : vector<8x32xf32>
    %58 = math.tanh %57 : vector<8x32xf32>
    %59 = arith.mulf %52, %58 : vector<8x32xf32>
    %60 = vector.extract_strided_slice %14 {offsets = [8, 0], sizes = [8, 128], strides = [1, 1]} : vector<64x128xf32> to vector<8x128xf32>
    %61 = arith.truncf %37 : vector<8x32xf32> to vector<8x32xbf16>
    %cst_22 = arith.constant dense<0.000000e+00> : vector<8x128xf32>
    %62 = tpu.matmul %61, %5, %cst_22 {dimension_numbers = #tpu.dot_dimension_numbers<[1], [0], [0], [1], [0, 0, 1, 1], [], []>} : vector<8x32xbf16>, vector<32x128xbf16>, vector<8x128xf32> -> vector<8x128xf32>
    %63 = arith.addf %60, %62 : vector<8x128xf32>
    %64 = arith.negf %63 : vector<8x128xf32>
    %65 = math.exp %64 : vector<8x128xf32>
    %cst_23 = arith.constant 1.000000e+00 : f32
    %66 = vector.broadcast %cst_23 : f32 to vector<8x128xf32>
    %67 = arith.addf %66, %65 : vector<8x128xf32>
    %68 = arith.divf %66, %67 : vector<8x128xf32>
    %69 = vector.extract_strided_slice %68 {offsets = [0, 0], sizes = [8, 32], strides = [1, 1]} : vector<8x128xf32> to vector<8x32xf32>
    %70 = vector.extract_strided_slice %68 {offsets = [0, 32], sizes = [8, 32], strides = [1, 1]} : vector<8x128xf32> to vector<8x32xf32>
    %71 = vector.extract_strided_slice %68 {offsets = [0, 64], sizes = [8, 32], strides = [1, 1]} : vector<8x128xf32> to vector<8x32xf32>
    %72 = vector.extract_strided_slice %63 {offsets = [0, 96], sizes = [8, 32], strides = [1, 1]} : vector<8x128xf32> to vector<8x32xf32>
    %73 = math.tanh %72 : vector<8x32xf32>
    %74 = arith.mulf %70, %35 : vector<8x32xf32>
    %75 = arith.mulf %69, %73 : vector<8x32xf32>
    %76 = arith.addf %74, %75 : vector<8x32xf32>
    %77 = math.tanh %76 : vector<8x32xf32>
    %78 = arith.mulf %71, %77 : vector<8x32xf32>
    %79 = arith.truncf %78 : vector<8x32xf32> to vector<8x32xbf16>
    %cst_24 = arith.constant dense<0.000000e+00> : vector<8x128xf32>
    %80 = tpu.matmul %79, %3, %cst_24 {dimension_numbers = #tpu.dot_dimension_numbers<[1], [0], [0], [1], [0, 0, 1, 1], [], []>} : vector<8x32xbf16>, vector<32x128xbf16>, vector<8x128xf32> -> vector<8x128xf32>
    %81 = vector.broadcast %9 : vector<1x128xf32> to vector<8x128xf32>
    %82 = arith.addf %81, %80 : vector<8x128xf32>
    %83 = arith.truncf %59 : vector<8x32xf32> to vector<8x32xbf16>
    %cst_25 = arith.constant dense<0.000000e+00> : vector<8x128xf32>
    %84 = tpu.matmul %83, %7, %cst_25 {dimension_numbers = #tpu.dot_dimension_numbers<[1], [0], [0], [1], [0, 0, 1, 1], [], []>} : vector<8x32xbf16>, vector<32x128xbf16>, vector<8x128xf32> -> vector<8x128xf32>
    %85 = arith.addf %82, %84 : vector<8x128xf32>
    %86 = arith.negf %85 : vector<8x128xf32>
    %87 = math.exp %86 : vector<8x128xf32>
    %cst_26 = arith.constant 1.000000e+00 : f32
    %88 = vector.broadcast %cst_26 : f32 to vector<8x128xf32>
    %89 = arith.addf %88, %87 : vector<8x128xf32>
    %90 = arith.divf %88, %89 : vector<8x128xf32>
    %91 = vector.extract_strided_slice %90 {offsets = [0, 0], sizes = [8, 32], strides = [1, 1]} : vector<8x128xf32> to vector<8x32xf32>
    %92 = vector.extract_strided_slice %90 {offsets = [0, 32], sizes = [8, 32], strides = [1, 1]} : vector<8x128xf32> to vector<8x32xf32>
    %93 = vector.extract_strided_slice %90 {offsets = [0, 64], sizes = [8, 32], strides = [1, 1]} : vector<8x128xf32> to vector<8x32xf32>
    %94 = vector.extract_strided_slice %85 {offsets = [0, 96], sizes = [8, 32], strides = [1, 1]} : vector<8x128xf32> to vector<8x32xf32>
    %95 = math.tanh %94 : vector<8x32xf32>
    %96 = arith.mulf %92, %57 : vector<8x32xf32>
    %97 = arith.mulf %91, %95 : vector<8x32xf32>
    %98 = arith.addf %96, %97 : vector<8x32xf32>
    %99 = math.tanh %98 : vector<8x32xf32>
    %100 = arith.mulf %93, %99 : vector<8x32xf32>
    %101 = vector.extract_strided_slice %14 {offsets = [16, 0], sizes = [8, 128], strides = [1, 1]} : vector<64x128xf32> to vector<8x128xf32>
    %102 = arith.truncf %78 : vector<8x32xf32> to vector<8x32xbf16>
    %cst_27 = arith.constant dense<0.000000e+00> : vector<8x128xf32>
    %103 = tpu.matmul %102, %5, %cst_27 {dimension_numbers = #tpu.dot_dimension_numbers<[1], [0], [0], [1], [0, 0, 1, 1], [], []>} : vector<8x32xbf16>, vector<32x128xbf16>, vector<8x128xf32> -> vector<8x128xf32>
    %104 = arith.addf %101, %103 : vector<8x128xf32>
    %105 = arith.negf %104 : vector<8x128xf32>
    %106 = math.exp %105 : vector<8x128xf32>
    %cst_28 = arith.constant 1.000000e+00 : f32
    %107 = vector.broadcast %cst_28 : f32 to vector<8x128xf32>
    %108 = arith.addf %107, %106 : vector<8x128xf32>
    %109 = arith.divf %107, %108 : vector<8x128xf32>
    %110 = vector.extract_strided_slice %109 {offsets = [0, 0], sizes = [8, 32], strides = [1, 1]} : vector<8x128xf32> to vector<8x32xf32>
    %111 = vector.extract_strided_slice %109 {offsets = [0, 32], sizes = [8, 32], strides = [1, 1]} : vector<8x128xf32> to vector<8x32xf32>
    %112 = vector.extract_strided_slice %109 {offsets = [0, 64], sizes = [8, 32], strides = [1, 1]} : vector<8x128xf32> to vector<8x32xf32>
    %113 = vector.extract_strided_slice %104 {offsets = [0, 96], sizes = [8, 32], strides = [1, 1]} : vector<8x128xf32> to vector<8x32xf32>
    %114 = math.tanh %113 : vector<8x32xf32>
    %115 = arith.mulf %111, %76 : vector<8x32xf32>
    %116 = arith.mulf %110, %114 : vector<8x32xf32>
    %117 = arith.addf %115, %116 : vector<8x32xf32>
    %118 = math.tanh %117 : vector<8x32xf32>
    %119 = arith.mulf %112, %118 : vector<8x32xf32>
    %120 = arith.truncf %119 : vector<8x32xf32> to vector<8x32xbf16>
    %cst_29 = arith.constant dense<0.000000e+00> : vector<8x128xf32>
    %121 = tpu.matmul %120, %3, %cst_29 {dimension_numbers = #tpu.dot_dimension_numbers<[1], [0], [0], [1], [0, 0, 1, 1], [], []>} : vector<8x32xbf16>, vector<32x128xbf16>, vector<8x128xf32> -> vector<8x128xf32>
    %122 = vector.broadcast %9 : vector<1x128xf32> to vector<8x128xf32>
    %123 = arith.addf %122, %121 : vector<8x128xf32>
    %124 = arith.truncf %100 : vector<8x32xf32> to vector<8x32xbf16>
    %cst_30 = arith.constant dense<0.000000e+00> : vector<8x128xf32>
    %125 = tpu.matmul %124, %7, %cst_30 {dimension_numbers = #tpu.dot_dimension_numbers<[1], [0], [0], [1], [0, 0, 1, 1], [], []>} : vector<8x32xbf16>, vector<32x128xbf16>, vector<8x128xf32> -> vector<8x128xf32>
    %126 = arith.addf %123, %125 : vector<8x128xf32>
    %127 = arith.negf %126 : vector<8x128xf32>
    %128 = math.exp %127 : vector<8x128xf32>
    %cst_31 = arith.constant 1.000000e+00 : f32
    %129 = vector.broadcast %cst_31 : f32 to vector<8x128xf32>
    %130 = arith.addf %129, %128 : vector<8x128xf32>
    %131 = arith.divf %129, %130 : vector<8x128xf32>
    %132 = vector.extract_strided_slice %131 {offsets = [0, 0], sizes = [8, 32], strides = [1, 1]} : vector<8x128xf32> to vector<8x32xf32>
    %133 = vector.extract_strided_slice %131 {offsets = [0, 32], sizes = [8, 32], strides = [1, 1]} : vector<8x128xf32> to vector<8x32xf32>
    %134 = vector.extract_strided_slice %131 {offsets = [0, 64], sizes = [8, 32], strides = [1, 1]} : vector<8x128xf32> to vector<8x32xf32>
    %135 = vector.extract_strided_slice %126 {offsets = [0, 96], sizes = [8, 32], strides = [1, 1]} : vector<8x128xf32> to vector<8x32xf32>
    %136 = math.tanh %135 : vector<8x32xf32>
    %137 = arith.mulf %133, %98 : vector<8x32xf32>
    %138 = arith.mulf %132, %136 : vector<8x32xf32>
    %139 = arith.addf %137, %138 : vector<8x32xf32>
    %140 = math.tanh %139 : vector<8x32xf32>
    %141 = arith.mulf %134, %140 : vector<8x32xf32>
    %142 = vector.extract_strided_slice %14 {offsets = [24, 0], sizes = [8, 128], strides = [1, 1]} : vector<64x128xf32> to vector<8x128xf32>
    %143 = arith.truncf %119 : vector<8x32xf32> to vector<8x32xbf16>
    %cst_32 = arith.constant dense<0.000000e+00> : vector<8x128xf32>
    %144 = tpu.matmul %143, %5, %cst_32 {dimension_numbers = #tpu.dot_dimension_numbers<[1], [0], [0], [1], [0, 0, 1, 1], [], []>} : vector<8x32xbf16>, vector<32x128xbf16>, vector<8x128xf32> -> vector<8x128xf32>
    %145 = arith.addf %142, %144 : vector<8x128xf32>
    %146 = arith.negf %145 : vector<8x128xf32>
    %147 = math.exp %146 : vector<8x128xf32>
    %cst_33 = arith.constant 1.000000e+00 : f32
    %148 = vector.broadcast %cst_33 : f32 to vector<8x128xf32>
    %149 = arith.addf %148, %147 : vector<8x128xf32>
    %150 = arith.divf %148, %149 : vector<8x128xf32>
    %151 = vector.extract_strided_slice %150 {offsets = [0, 0], sizes = [8, 32], strides = [1, 1]} : vector<8x128xf32> to vector<8x32xf32>
    %152 = vector.extract_strided_slice %150 {offsets = [0, 32], sizes = [8, 32], strides = [1, 1]} : vector<8x128xf32> to vector<8x32xf32>
    %153 = vector.extract_strided_slice %150 {offsets = [0, 64], sizes = [8, 32], strides = [1, 1]} : vector<8x128xf32> to vector<8x32xf32>
    %154 = vector.extract_strided_slice %145 {offsets = [0, 96], sizes = [8, 32], strides = [1, 1]} : vector<8x128xf32> to vector<8x32xf32>
    %155 = math.tanh %154 : vector<8x32xf32>
    %156 = arith.mulf %152, %117 : vector<8x32xf32>
    %157 = arith.mulf %151, %155 : vector<8x32xf32>
    %158 = arith.addf %156, %157 : vector<8x32xf32>
    %159 = math.tanh %158 : vector<8x32xf32>
    %160 = arith.mulf %153, %159 : vector<8x32xf32>
    %161 = arith.truncf %160 : vector<8x32xf32> to vector<8x32xbf16>
    %cst_34 = arith.constant dense<0.000000e+00> : vector<8x128xf32>
    %162 = tpu.matmul %161, %3, %cst_34 {dimension_numbers = #tpu.dot_dimension_numbers<[1], [0], [0], [1], [0, 0, 1, 1], [], []>} : vector<8x32xbf16>, vector<32x128xbf16>, vector<8x128xf32> -> vector<8x128xf32>
    %163 = vector.broadcast %9 : vector<1x128xf32> to vector<8x128xf32>
    %164 = arith.addf %163, %162 : vector<8x128xf32>
    %165 = arith.truncf %141 : vector<8x32xf32> to vector<8x32xbf16>
    %cst_35 = arith.constant dense<0.000000e+00> : vector<8x128xf32>
    %166 = tpu.matmul %165, %7, %cst_35 {dimension_numbers = #tpu.dot_dimension_numbers<[1], [0], [0], [1], [0, 0, 1, 1], [], []>} : vector<8x32xbf16>, vector<32x128xbf16>, vector<8x128xf32> -> vector<8x128xf32>
    %167 = arith.addf %164, %166 : vector<8x128xf32>
    %168 = arith.negf %167 : vector<8x128xf32>
    %169 = math.exp %168 : vector<8x128xf32>
    %cst_36 = arith.constant 1.000000e+00 : f32
    %170 = vector.broadcast %cst_36 : f32 to vector<8x128xf32>
    %171 = arith.addf %170, %169 : vector<8x128xf32>
    %172 = arith.divf %170, %171 : vector<8x128xf32>
    %173 = vector.extract_strided_slice %172 {offsets = [0, 0], sizes = [8, 32], strides = [1, 1]} : vector<8x128xf32> to vector<8x32xf32>
    %174 = vector.extract_strided_slice %172 {offsets = [0, 32], sizes = [8, 32], strides = [1, 1]} : vector<8x128xf32> to vector<8x32xf32>
    %175 = vector.extract_strided_slice %172 {offsets = [0, 64], sizes = [8, 32], strides = [1, 1]} : vector<8x128xf32> to vector<8x32xf32>
    %176 = vector.extract_strided_slice %167 {offsets = [0, 96], sizes = [8, 32], strides = [1, 1]} : vector<8x128xf32> to vector<8x32xf32>
    %177 = math.tanh %176 : vector<8x32xf32>
    %178 = arith.mulf %174, %139 : vector<8x32xf32>
    %179 = arith.mulf %173, %177 : vector<8x32xf32>
    %180 = arith.addf %178, %179 : vector<8x32xf32>
    %181 = math.tanh %180 : vector<8x32xf32>
    %182 = arith.mulf %175, %181 : vector<8x32xf32>
    %183 = vector.extract_strided_slice %14 {offsets = [32, 0], sizes = [8, 128], strides = [1, 1]} : vector<64x128xf32> to vector<8x128xf32>
    %184 = arith.truncf %160 : vector<8x32xf32> to vector<8x32xbf16>
    %cst_37 = arith.constant dense<0.000000e+00> : vector<8x128xf32>
    %185 = tpu.matmul %184, %5, %cst_37 {dimension_numbers = #tpu.dot_dimension_numbers<[1], [0], [0], [1], [0, 0, 1, 1], [], []>} : vector<8x32xbf16>, vector<32x128xbf16>, vector<8x128xf32> -> vector<8x128xf32>
    %186 = arith.addf %183, %185 : vector<8x128xf32>
    %187 = arith.negf %186 : vector<8x128xf32>
    %188 = math.exp %187 : vector<8x128xf32>
    %cst_38 = arith.constant 1.000000e+00 : f32
    %189 = vector.broadcast %cst_38 : f32 to vector<8x128xf32>
    %190 = arith.addf %189, %188 : vector<8x128xf32>
    %191 = arith.divf %189, %190 : vector<8x128xf32>
    %192 = vector.extract_strided_slice %191 {offsets = [0, 0], sizes = [8, 32], strides = [1, 1]} : vector<8x128xf32> to vector<8x32xf32>
    %193 = vector.extract_strided_slice %191 {offsets = [0, 32], sizes = [8, 32], strides = [1, 1]} : vector<8x128xf32> to vector<8x32xf32>
    %194 = vector.extract_strided_slice %191 {offsets = [0, 64], sizes = [8, 32], strides = [1, 1]} : vector<8x128xf32> to vector<8x32xf32>
    %195 = vector.extract_strided_slice %186 {offsets = [0, 96], sizes = [8, 32], strides = [1, 1]} : vector<8x128xf32> to vector<8x32xf32>
    %196 = math.tanh %195 : vector<8x32xf32>
    %197 = arith.mulf %193, %158 : vector<8x32xf32>
    %198 = arith.mulf %192, %196 : vector<8x32xf32>
    %199 = arith.addf %197, %198 : vector<8x32xf32>
    %200 = math.tanh %199 : vector<8x32xf32>
    %201 = arith.mulf %194, %200 : vector<8x32xf32>
    %202 = arith.truncf %201 : vector<8x32xf32> to vector<8x32xbf16>
    %cst_39 = arith.constant dense<0.000000e+00> : vector<8x128xf32>
    %203 = tpu.matmul %202, %3, %cst_39 {dimension_numbers = #tpu.dot_dimension_numbers<[1], [0], [0], [1], [0, 0, 1, 1], [], []>} : vector<8x32xbf16>, vector<32x128xbf16>, vector<8x128xf32> -> vector<8x128xf32>
    %204 = vector.broadcast %9 : vector<1x128xf32> to vector<8x128xf32>
    %205 = arith.addf %204, %203 : vector<8x128xf32>
    %206 = arith.truncf %182 : vector<8x32xf32> to vector<8x32xbf16>
    %cst_40 = arith.constant dense<0.000000e+00> : vector<8x128xf32>
    %207 = tpu.matmul %206, %7, %cst_40 {dimension_numbers = #tpu.dot_dimension_numbers<[1], [0], [0], [1], [0, 0, 1, 1], [], []>} : vector<8x32xbf16>, vector<32x128xbf16>, vector<8x128xf32> -> vector<8x128xf32>
    %208 = arith.addf %205, %207 : vector<8x128xf32>
    %209 = arith.negf %208 : vector<8x128xf32>
    %210 = math.exp %209 : vector<8x128xf32>
    %cst_41 = arith.constant 1.000000e+00 : f32
    %211 = vector.broadcast %cst_41 : f32 to vector<8x128xf32>
    %212 = arith.addf %211, %210 : vector<8x128xf32>
    %213 = arith.divf %211, %212 : vector<8x128xf32>
    %214 = vector.extract_strided_slice %213 {offsets = [0, 0], sizes = [8, 32], strides = [1, 1]} : vector<8x128xf32> to vector<8x32xf32>
    %215 = vector.extract_strided_slice %213 {offsets = [0, 32], sizes = [8, 32], strides = [1, 1]} : vector<8x128xf32> to vector<8x32xf32>
    %216 = vector.extract_strided_slice %213 {offsets = [0, 64], sizes = [8, 32], strides = [1, 1]} : vector<8x128xf32> to vector<8x32xf32>
    %217 = vector.extract_strided_slice %208 {offsets = [0, 96], sizes = [8, 32], strides = [1, 1]} : vector<8x128xf32> to vector<8x32xf32>
    %218 = math.tanh %217 : vector<8x32xf32>
    %219 = arith.mulf %215, %180 : vector<8x32xf32>
    %220 = arith.mulf %214, %218 : vector<8x32xf32>
    %221 = arith.addf %219, %220 : vector<8x32xf32>
    %222 = math.tanh %221 : vector<8x32xf32>
    %223 = arith.mulf %216, %222 : vector<8x32xf32>
    %224 = vector.extract_strided_slice %14 {offsets = [40, 0], sizes = [8, 128], strides = [1, 1]} : vector<64x128xf32> to vector<8x128xf32>
    %225 = arith.truncf %201 : vector<8x32xf32> to vector<8x32xbf16>
    %cst_42 = arith.constant dense<0.000000e+00> : vector<8x128xf32>
    %226 = tpu.matmul %225, %5, %cst_42 {dimension_numbers = #tpu.dot_dimension_numbers<[1], [0], [0], [1], [0, 0, 1, 1], [], []>} : vector<8x32xbf16>, vector<32x128xbf16>, vector<8x128xf32> -> vector<8x128xf32>
    %227 = arith.addf %224, %226 : vector<8x128xf32>
    %228 = arith.negf %227 : vector<8x128xf32>
    %229 = math.exp %228 : vector<8x128xf32>
    %cst_43 = arith.constant 1.000000e+00 : f32
    %230 = vector.broadcast %cst_43 : f32 to vector<8x128xf32>
    %231 = arith.addf %230, %229 : vector<8x128xf32>
    %232 = arith.divf %230, %231 : vector<8x128xf32>
    %233 = vector.extract_strided_slice %232 {offsets = [0, 0], sizes = [8, 32], strides = [1, 1]} : vector<8x128xf32> to vector<8x32xf32>
    %234 = vector.extract_strided_slice %232 {offsets = [0, 32], sizes = [8, 32], strides = [1, 1]} : vector<8x128xf32> to vector<8x32xf32>
    %235 = vector.extract_strided_slice %232 {offsets = [0, 64], sizes = [8, 32], strides = [1, 1]} : vector<8x128xf32> to vector<8x32xf32>
    %236 = vector.extract_strided_slice %227 {offsets = [0, 96], sizes = [8, 32], strides = [1, 1]} : vector<8x128xf32> to vector<8x32xf32>
    %237 = math.tanh %236 : vector<8x32xf32>
    %238 = arith.mulf %234, %199 : vector<8x32xf32>
    %239 = arith.mulf %233, %237 : vector<8x32xf32>
    %240 = arith.addf %238, %239 : vector<8x32xf32>
    %241 = math.tanh %240 : vector<8x32xf32>
    %242 = arith.mulf %235, %241 : vector<8x32xf32>
    %243 = arith.truncf %242 : vector<8x32xf32> to vector<8x32xbf16>
    %cst_44 = arith.constant dense<0.000000e+00> : vector<8x128xf32>
    %244 = tpu.matmul %243, %3, %cst_44 {dimension_numbers = #tpu.dot_dimension_numbers<[1], [0], [0], [1], [0, 0, 1, 1], [], []>} : vector<8x32xbf16>, vector<32x128xbf16>, vector<8x128xf32> -> vector<8x128xf32>
    %245 = vector.broadcast %9 : vector<1x128xf32> to vector<8x128xf32>
    %246 = arith.addf %245, %244 : vector<8x128xf32>
    %247 = arith.truncf %223 : vector<8x32xf32> to vector<8x32xbf16>
    %cst_45 = arith.constant dense<0.000000e+00> : vector<8x128xf32>
    %248 = tpu.matmul %247, %7, %cst_45 {dimension_numbers = #tpu.dot_dimension_numbers<[1], [0], [0], [1], [0, 0, 1, 1], [], []>} : vector<8x32xbf16>, vector<32x128xbf16>, vector<8x128xf32> -> vector<8x128xf32>
    %249 = arith.addf %246, %248 : vector<8x128xf32>
    %250 = arith.negf %249 : vector<8x128xf32>
    %251 = math.exp %250 : vector<8x128xf32>
    %cst_46 = arith.constant 1.000000e+00 : f32
    %252 = vector.broadcast %cst_46 : f32 to vector<8x128xf32>
    %253 = arith.addf %252, %251 : vector<8x128xf32>
    %254 = arith.divf %252, %253 : vector<8x128xf32>
    %255 = vector.extract_strided_slice %254 {offsets = [0, 0], sizes = [8, 32], strides = [1, 1]} : vector<8x128xf32> to vector<8x32xf32>
    %256 = vector.extract_strided_slice %254 {offsets = [0, 32], sizes = [8, 32], strides = [1, 1]} : vector<8x128xf32> to vector<8x32xf32>
    %257 = vector.extract_strided_slice %254 {offsets = [0, 64], sizes = [8, 32], strides = [1, 1]} : vector<8x128xf32> to vector<8x32xf32>
    %258 = vector.extract_strided_slice %249 {offsets = [0, 96], sizes = [8, 32], strides = [1, 1]} : vector<8x128xf32> to vector<8x32xf32>
    %259 = math.tanh %258 : vector<8x32xf32>
    %260 = arith.mulf %256, %221 : vector<8x32xf32>
    %261 = arith.mulf %255, %259 : vector<8x32xf32>
    %262 = arith.addf %260, %261 : vector<8x32xf32>
    %263 = math.tanh %262 : vector<8x32xf32>
    %264 = arith.mulf %257, %263 : vector<8x32xf32>
    %265 = vector.extract_strided_slice %14 {offsets = [48, 0], sizes = [8, 128], strides = [1, 1]} : vector<64x128xf32> to vector<8x128xf32>
    %266 = arith.truncf %242 : vector<8x32xf32> to vector<8x32xbf16>
    %cst_47 = arith.constant dense<0.000000e+00> : vector<8x128xf32>
    %267 = tpu.matmul %266, %5, %cst_47 {dimension_numbers = #tpu.dot_dimension_numbers<[1], [0], [0], [1], [0, 0, 1, 1], [], []>} : vector<8x32xbf16>, vector<32x128xbf16>, vector<8x128xf32> -> vector<8x128xf32>
    %268 = arith.addf %265, %267 : vector<8x128xf32>
    %269 = arith.negf %268 : vector<8x128xf32>
    %270 = math.exp %269 : vector<8x128xf32>
    %cst_48 = arith.constant 1.000000e+00 : f32
    %271 = vector.broadcast %cst_48 : f32 to vector<8x128xf32>
    %272 = arith.addf %271, %270 : vector<8x128xf32>
    %273 = arith.divf %271, %272 : vector<8x128xf32>
    %274 = vector.extract_strided_slice %273 {offsets = [0, 0], sizes = [8, 32], strides = [1, 1]} : vector<8x128xf32> to vector<8x32xf32>
    %275 = vector.extract_strided_slice %273 {offsets = [0, 32], sizes = [8, 32], strides = [1, 1]} : vector<8x128xf32> to vector<8x32xf32>
    %276 = vector.extract_strided_slice %273 {offsets = [0, 64], sizes = [8, 32], strides = [1, 1]} : vector<8x128xf32> to vector<8x32xf32>
    %277 = vector.extract_strided_slice %268 {offsets = [0, 96], sizes = [8, 32], strides = [1, 1]} : vector<8x128xf32> to vector<8x32xf32>
    %278 = math.tanh %277 : vector<8x32xf32>
    %279 = arith.mulf %275, %240 : vector<8x32xf32>
    %280 = arith.mulf %274, %278 : vector<8x32xf32>
    %281 = arith.addf %279, %280 : vector<8x32xf32>
    %282 = math.tanh %281 : vector<8x32xf32>
    %283 = arith.mulf %276, %282 : vector<8x32xf32>
    %284 = arith.truncf %283 : vector<8x32xf32> to vector<8x32xbf16>
    %cst_49 = arith.constant dense<0.000000e+00> : vector<8x128xf32>
    %285 = tpu.matmul %284, %3, %cst_49 {dimension_numbers = #tpu.dot_dimension_numbers<[1], [0], [0], [1], [0, 0, 1, 1], [], []>} : vector<8x32xbf16>, vector<32x128xbf16>, vector<8x128xf32> -> vector<8x128xf32>
    %286 = vector.broadcast %9 : vector<1x128xf32> to vector<8x128xf32>
    %287 = arith.addf %286, %285 : vector<8x128xf32>
    %288 = arith.truncf %264 : vector<8x32xf32> to vector<8x32xbf16>
    %cst_50 = arith.constant dense<0.000000e+00> : vector<8x128xf32>
    %289 = tpu.matmul %288, %7, %cst_50 {dimension_numbers = #tpu.dot_dimension_numbers<[1], [0], [0], [1], [0, 0, 1, 1], [], []>} : vector<8x32xbf16>, vector<32x128xbf16>, vector<8x128xf32> -> vector<8x128xf32>
    %290 = arith.addf %287, %289 : vector<8x128xf32>
    %291 = arith.negf %290 : vector<8x128xf32>
    %292 = math.exp %291 : vector<8x128xf32>
    %cst_51 = arith.constant 1.000000e+00 : f32
    %293 = vector.broadcast %cst_51 : f32 to vector<8x128xf32>
    %294 = arith.addf %293, %292 : vector<8x128xf32>
    %295 = arith.divf %293, %294 : vector<8x128xf32>
    %296 = vector.extract_strided_slice %295 {offsets = [0, 0], sizes = [8, 32], strides = [1, 1]} : vector<8x128xf32> to vector<8x32xf32>
    %297 = vector.extract_strided_slice %295 {offsets = [0, 32], sizes = [8, 32], strides = [1, 1]} : vector<8x128xf32> to vector<8x32xf32>
    %298 = vector.extract_strided_slice %295 {offsets = [0, 64], sizes = [8, 32], strides = [1, 1]} : vector<8x128xf32> to vector<8x32xf32>
    %299 = vector.extract_strided_slice %290 {offsets = [0, 96], sizes = [8, 32], strides = [1, 1]} : vector<8x128xf32> to vector<8x32xf32>
    %300 = math.tanh %299 : vector<8x32xf32>
    %301 = arith.mulf %297, %262 : vector<8x32xf32>
    %302 = arith.mulf %296, %300 : vector<8x32xf32>
    %303 = arith.addf %301, %302 : vector<8x32xf32>
    %304 = math.tanh %303 : vector<8x32xf32>
    %305 = arith.mulf %298, %304 : vector<8x32xf32>
    %306 = vector.extract_strided_slice %14 {offsets = [56, 0], sizes = [8, 128], strides = [1, 1]} : vector<64x128xf32> to vector<8x128xf32>
    %307 = arith.truncf %283 : vector<8x32xf32> to vector<8x32xbf16>
    %cst_52 = arith.constant dense<0.000000e+00> : vector<8x128xf32>
    %308 = tpu.matmul %307, %5, %cst_52 {dimension_numbers = #tpu.dot_dimension_numbers<[1], [0], [0], [1], [0, 0, 1, 1], [], []>} : vector<8x32xbf16>, vector<32x128xbf16>, vector<8x128xf32> -> vector<8x128xf32>
    %309 = arith.addf %306, %308 : vector<8x128xf32>
    %310 = arith.negf %309 : vector<8x128xf32>
    %311 = math.exp %310 : vector<8x128xf32>
    %cst_53 = arith.constant 1.000000e+00 : f32
    %312 = vector.broadcast %cst_53 : f32 to vector<8x128xf32>
    %313 = arith.addf %312, %311 : vector<8x128xf32>
    %314 = arith.divf %312, %313 : vector<8x128xf32>
    %315 = vector.extract_strided_slice %314 {offsets = [0, 0], sizes = [8, 32], strides = [1, 1]} : vector<8x128xf32> to vector<8x32xf32>
    %316 = vector.extract_strided_slice %314 {offsets = [0, 32], sizes = [8, 32], strides = [1, 1]} : vector<8x128xf32> to vector<8x32xf32>
    %317 = vector.extract_strided_slice %314 {offsets = [0, 64], sizes = [8, 32], strides = [1, 1]} : vector<8x128xf32> to vector<8x32xf32>
    %318 = vector.extract_strided_slice %309 {offsets = [0, 96], sizes = [8, 32], strides = [1, 1]} : vector<8x128xf32> to vector<8x32xf32>
    %319 = math.tanh %318 : vector<8x32xf32>
    %320 = arith.mulf %316, %281 : vector<8x32xf32>
    %321 = arith.mulf %315, %319 : vector<8x32xf32>
    %322 = arith.addf %320, %321 : vector<8x32xf32>
    %323 = math.tanh %322 : vector<8x32xf32>
    %324 = arith.mulf %317, %323 : vector<8x32xf32>
    %325 = arith.truncf %324 : vector<8x32xf32> to vector<8x32xbf16>
    %cst_54 = arith.constant dense<0.000000e+00> : vector<8x128xf32>
    %326 = tpu.matmul %325, %3, %cst_54 {dimension_numbers = #tpu.dot_dimension_numbers<[1], [0], [0], [1], [0, 0, 1, 1], [], []>} : vector<8x32xbf16>, vector<32x128xbf16>, vector<8x128xf32> -> vector<8x128xf32>
    %327 = vector.broadcast %9 : vector<1x128xf32> to vector<8x128xf32>
    %328 = arith.addf %327, %326 : vector<8x128xf32>
    %329 = arith.truncf %305 : vector<8x32xf32> to vector<8x32xbf16>
    %cst_55 = arith.constant dense<0.000000e+00> : vector<8x128xf32>
    %330 = tpu.matmul %329, %7, %cst_55 {dimension_numbers = #tpu.dot_dimension_numbers<[1], [0], [0], [1], [0, 0, 1, 1], [], []>} : vector<8x32xbf16>, vector<32x128xbf16>, vector<8x128xf32> -> vector<8x128xf32>
    %331 = arith.addf %328, %330 : vector<8x128xf32>
    %332 = arith.negf %331 : vector<8x128xf32>
    %333 = math.exp %332 : vector<8x128xf32>
    %cst_56 = arith.constant 1.000000e+00 : f32
    %334 = vector.broadcast %cst_56 : f32 to vector<8x128xf32>
    %335 = arith.addf %334, %333 : vector<8x128xf32>
    %336 = arith.divf %334, %335 : vector<8x128xf32>
    %337 = vector.extract_strided_slice %336 {offsets = [0, 0], sizes = [8, 32], strides = [1, 1]} : vector<8x128xf32> to vector<8x32xf32>
    %338 = vector.extract_strided_slice %336 {offsets = [0, 32], sizes = [8, 32], strides = [1, 1]} : vector<8x128xf32> to vector<8x32xf32>
    %339 = vector.extract_strided_slice %336 {offsets = [0, 64], sizes = [8, 32], strides = [1, 1]} : vector<8x128xf32> to vector<8x32xf32>
    %340 = vector.extract_strided_slice %331 {offsets = [0, 96], sizes = [8, 32], strides = [1, 1]} : vector<8x128xf32> to vector<8x32xf32>
    %341 = math.tanh %340 : vector<8x32xf32>
    %342 = arith.mulf %338, %303 : vector<8x32xf32>
    %343 = arith.mulf %337, %341 : vector<8x32xf32>
    %344 = arith.addf %342, %343 : vector<8x32xf32>
    %345 = math.tanh %344 : vector<8x32xf32>
    %346 = arith.mulf %339, %345 : vector<8x32xf32>
    %c0_57 = arith.constant 0 : index
    %c0_58 = arith.constant 0 : index
    %347 = vector.load %arg7[%c0_57, %c0_58] : memref<1x32xf32, #tpu.memory_space<vmem>>, vector<1x32xf32>
    %348 = vector.broadcast %347 : vector<1x32xf32> to vector<8x32xf32>
    %349 = arith.mulf %346, %348 : vector<8x32xf32>
    %cst_59 = arith.constant dense<0.000000e+00> : vector<8xf32>
    %350 = vector.multi_reduction <add>, %349, %cst_59 [1] : vector<8x32xf32> to vector<8xf32>
    %351 = vector.shape_cast %350 : vector<8xf32> to vector<8x1xf32>
    %c0_60 = arith.constant 0 : index
    %c0_61 = arith.constant 0 : index
    %352 = vector.load %arg8[%c0_60, %c0_61] : memref<1x1xf32, #tpu.memory_space<vmem>>, vector<1x1xf32>
    %353 = vector.broadcast %352 : vector<1x1xf32> to vector<8x1xf32>
    %354 = arith.addf %351, %353 : vector<8x1xf32>
    %c0_62 = arith.constant 0 : index
    %c0_63 = arith.constant 0 : index
    %355 = vector.load %arg9[%c0_62, %c0_63] : memref<8x1xf32, #tpu.memory_space<vmem>>, vector<8x1xf32>
    tpu.vector_store %arg9[%c0_62, %c0_63], %354 {strides = array<i32>} : memref<8x1xf32, #tpu.memory_space<vmem>>, vector<8x1xf32>,
    return
  }
}

</mosaic_0001>

<bundles_post_ra>
// kernel: lstm_model_forward.1
= control target key start
LH: loop header
LB: loop body
LE: loop exit
PB: predicated region body
PF: predicated region fallthrough
CT: control target
= control target key end

     0   :  { %vm85_vm0 = vcmask 1041408   ;;  %vm72_vm1 = vcmask 31744   ;;  %v1362_v12 = vmov 0   ;;  %s1363_s23 = smov 32   ;;  %vm118_vm6 = vcmask 261120   ;;  %s1738_s2 = inlined_call_operand.vmem [shape: f32[32,128], index: 2, kind: input, shape index: {}]   ;;  %s1739_s1 = inlined_call_operand.vmem [shape: f32[4,128], index: 1, kind: input, shape index: {}]   ;;  %s1740_s0 = inlined_call_operand.vmem [shape: f32[64,4], index: 0, kind: input, shape index: {}]   ;;  %s1741_s3 = inlined_call_operand.vmem [shape: f32[1,128], index: 3, kind: input, shape index: {}]   ;;  %s1742_s5 = inlined_call_operand.vmem [shape: f32[32,128], index: 5, kind: input, shape index: {}]   ;;  %s1743_s4 = inlined_call_operand.vmem [shape: f32[32,128], index: 4, kind: input, shape index: {}]   ;;  %s1744_s6 = inlined_call_operand.vmem [shape: f32[1,128], index: 6, kind: input, shape index: {}]   ;;  %s1745_s7 = inlined_call_operand.vmem [shape: f32[1,32], index: 7, kind: input, shape index: {}]   ;;  %s1746_s8 = inlined_call_operand.<no memory space> [shape: f32[1,1], index: 8, kind: input, shape index: {}]   ;;  %s1747_s9 = inlined_call_operand.vmem [shape: f32[8,1], index: 9, kind: output, shape index: {}]  }
   0x1   :  { %v45_v0 = vld [vmem:[%s1738_s2 + $0x10] sm:$0xff]  ;;  %v46_v1 = vld [vmem:[%s1738_s2 + $0x18] sm:$0xff]  ;;  %v35_v2 = vld [vmem:[%s1739_s1] sm:$0xf] }
   0x2   :  { %v1424_v3 = vpack.c.bf16 %v46_v1, %v45_v0  ;;  %v36_v4 = vpack.c.bf16 %v35_v2, %v35_v2  ;;  %v57_v5 = vld [vmem:[%s1740_s0] sm:$0xff]  ;;  %v58_v6 = vld [vmem:[%s1740_s0 + $0x8] sm:$0xff]  ;;  %v51_v39 = vld [vmem:[%s1742_s5 + $0x10] sm:$0xff] }
   0x3   :  { %v43_v7 = vld [vmem:[%s1738_s2] sm:$0xff]  ;;  %v44_v8 = vld [vmem:[%s1738_s2 + $0x8] sm:$0xff]  ;;  %v65_v10 = vpack.c.bf16 %v58_v6, %v57_v5  ;;  %v52_v40 = vld [vmem:[%s1742_s5 + $0x18] sm:$0xff] }
   0x4   :  { %128 = vmatpush.bf16.msra.mxu1 %v1424_v3  ;;  %v87_v9 = vsel %vm85_vm0, %v36_v4, 0  ;;  %v1439_v11 = vpack.c.bf16 %v44_v8, %v43_v7  ;;  %v1453_v13 = vld [vmem:[%s1741_s3] ss:$0 sm:$0xff]  ;;  %v1471_v42 = vpack.c.bf16 %v52_v40, %v51_v39  ;;  %v50_v43 = vld [vmem:[%s1742_s5 + $0x8] sm:$0xff]  ;;  %v39_v44 = vld [vmem:[%s1743_s4 + $0x10] sm:$0xff] }
   0x5   :  { %96 = vmatpush.bf16.msra.mxu0 %v87_v9  ;;  %v49_v41 = vld [vmem:[%s1742_s5] sm:$0xff]  ;;  %v40_v45 = vld [vmem:[%s1743_s4 + $0x18] sm:$0xff]  ;;  %v38_v48 = vld [vmem:[%s1743_s4 + $0x8] sm:$0xff] }
   0x6   :  { %v1482_v46 = vpack.c.bf16 %v40_v45, %v39_v44  ;;  %v37_v47 = vld [vmem:[%s1743_s4] sm:$0xff]  ;;  %203 = vmatpush.bf16.msra.mxu3 %v1471_v42  ;;  %v1491_v49 = vpack.c.bf16 %v50_v43, %v49_v41  ;;  %s1364_s4 = smov 64  }
   0x7   :  { %v1494_v50 = vpack.c.bf16 %v38_v48, %v37_v47  ;;  %v1518_v61 = vld [vmem:[%s1744_s6] ss:$0 sm:$0xff] }
   0x8   :  { %1183 = vmatmul.msk.bf16.vlgmr.msra.gmra.mxu0 %vm72_vm1, %v65_v10  ;;  %129 = vmatpush.bf16.msra.mxu1 %v1439_v11 }
   0x9   :  { %644 = vmatpush.bf16.msrb.mxu0 %v1424_v3  ;;  %186 = vmatpush.bf16.msra.mxu2 %v1482_v46 }
   0xa   :  { %204 = vmatpush.bf16.msra.mxu3 %v1491_v49 }
   0xb   :  { %130 = vmatmul.bf16.vlgmr.msra.gmra.mxu1 %v1362_v12 }
   0xc   :  { %254 = vmatpush.bf16.msrb.mxu1 %v1424_v3 }
   0xd   :  { %645 = vmatpush.bf16.msrb.mxu0 %v1439_v11  ;;  %187 = vmatpush.bf16.msra.mxu2 %v1494_v50 }
   0xe   :  { %333 = vmatpush.bf16.msrb.mxu3 %v1471_v42 }
   0xf   :  { %205 = vmatmul.bf16.vlgmr.msra.gmra.mxu3 %v1362_v12 }
  0x10   :  { %255 = vmatpush.bf16.msrb.mxu1 %v1439_v11 }
  0x11   :  { %832 = vmatpush.bf16.msra.mxu0 %v1482_v46  ;;  %312 = vmatpush.bf16.msrb.mxu2 %v1482_v46 }
  0x12   :  { %334 = vmatpush.bf16.msrb.mxu3 %v1491_v49 }
  0x14   :  { %384 = vmatpush.bf16.msra.mxu1 %v1424_v3 }
  0x15   :  { %833 = vmatpush.bf16.msra.mxu0 %v1494_v50  ;;  %313 = vmatpush.bf16.msrb.mxu2 %v1494_v50 }
  0x16   :  { %463 = vmatpush.bf16.msra.mxu3 %v1471_v42 }
  0x18   :  { %385 = vmatpush.bf16.msra.mxu1 %v1439_v11 }
  0x1a   :  { %464 = vmatpush.bf16.msra.mxu3 %v1491_v49 }
  0x85   :  { %v98_v14 = vpop.f32.mrf.mxu0 }
  0x86   :  { %v99_v15 = vadd.f32 %v1453_v13, %v98_v14 }
  0x88   :  { %v131_v16 = vpop.f32.mrf.mxu1 }
  0x89   :  { %v135_v17 = vadd.f32 %v131_v16, %v99_v15 }
  0x8b   :  { %1232 = vtanh.f32 %v135_v17  ;;  %v1187_v20 = vmul.f32 -1.442695, %v135_v17 }
  0x8d   :  { %1234 = vpow2.f32 %v1187_v20  ;;  %v100_v57 = vpop.f32.mrf.mxu0 }
  0x8e   :  { %v101_v58 = vadd.f32 %v1453_v13, %v100_v57 }
  0x90   :  { %v133_v18 = vpop.f32.mrf.mxu1 }
  0x91   :  { %v1233_v19 = vpop.eup %1232 }
  0x92   :  { %158 = vrot.lane.b32.xlu0 %v1233_v19, %s1363_s23  ;;  %v206_v54 = vpop.f32.mrf.mxu3 }
  0x93   :  { %v1235_v21 = vpop.eup %1234 }
  0x94   :  { %v139_v22 = vadd.f32 1.0, %v1235_v21 }
  0x96   :  { %1236 = vrcp.f32 %v139_v22  ;;  %v151_v28 = vand.u32 2147483648, %v139_v22  ;;  %vm145_vm3 = vweird.f32 %v139_v22  ;;  %v149_v29 = vand.u32 2147483647, %v139_v22 }
  0x98   :  { %v152_v31 = vor.u32 1.1754944e-38, %v151_v28  ;;  %vm150_vm5 = vcmp.eq.f32.partialorder %v149_v29, 8.507059e+37 }
  0x9a   :  { %v208_v56 = vpop.f32.mrf.mxu3 }
  0x9c   :  { %v1237_v23 = vpop.eup %1236 }
  0x9d   :  { %v141_v24 = vmul.f32 %v1237_v23, %v139_v22  ;;  %vm146_vm2 = vweird.f32 %v1237_v23 }
  0x9e   :  { %vm147_vm4 = vmor %vm145_vm3, %vm146_vm2 }
  0x9f   :  { %v142_v25 = vsub.f32 1.0, %v141_v24 }
  0xa1   :  { %v143_v26 = vmul.f32 %v1237_v23, %v142_v25 }
  0xa3   :  { %v144_v27 = vadd.f32 %v1237_v23, %v143_v26 }
  0xa5   :  { %v148_v30 = vsel %vm147_vm4, %v1237_v23, %v144_v27 }
  0xa6   :  { %v153_v33 = vsel %vm150_vm5, %v152_v31, %v148_v30 }
  0xa7   :  { %v156_v35 = vmul.f32 0.0, %v153_v33 }
 0x104   :  { %v159_v32 = vpop.permute.xlu0 %158 }
 0x105   :  { %v161_v34 = vmul.f32 %v159_v32, %v153_v33 }
 0x107   :  { %163 = vrot.lane.b32.xlu0 %v161_v34, %s1363_s23 }
 0x179   :  { %v164_v36 = vpop.permute.xlu0 %163 }
 0x17a   :  { %v1458_v37 = vadd.f32 %v164_v36, %v156_v35 }
 0x17c   :  { %1238 = vtanh.f32 %v1458_v37 }
 0x182   :  { %v1239_v38 = vpop.eup %1238 }
 0x183   :  { %169 = vrot.lane.b32.xlu1 %v1239_v38, %s1363_s23 }
 0x1f5   :  { %v170_v51 = vpop.permute.xlu1 %169 }
 0x1f6   :  { %v172_v52 = vmul.f32 %v170_v51, %v153_v33 }
 0x1f8   :  { %v173_v53 = vpack.c.bf16 %v172_v52, %v172_v52 }
 0x1fa   :  { %175 = vrot.lane.b32.xlu1 %v173_v53, %s1364_s4  ;;  %v59_v53 = vld [vmem:[%s1740_s0 + $0x10] sm:$0xff] }
 0x26c   :  { %v176_v55 = vpop.permute.xlu1 %175 }
 0x26d   :  { %1188 = vmatmul.msk.bf16.vlgmr.msra.gmra.mxu2 %vm118_vm6, %v176_v55  ;;  %1190 = vmatmul.msk.bf16.vlgmr.msrb.gmra.mxu1 %vm118_vm6, %v176_v55 }
 0x26e   :  { %442 = vmatpush.bf16.msra.mxu2 %v1482_v46  ;;  %514 = vmatpush.bf16.msrb.mxu1 %v1424_v3 }
 0x272   :  { %443 = vmatpush.bf16.msra.mxu2 %v1494_v50  ;;  %515 = vmatpush.bf16.msrb.mxu1 %v1439_v11 }
 0x2ea   :  { %v257_v59 = vpop.f32.mrf.mxu1 }
 0x2eb   :  { %v261_v60 = vadd.f32 %v257_v59, %v101_v58 }
 0x2ed   :  { %1240 = vtanh.f32 %v261_v60  ;;  %v1191_v6 = vmul.f32 -1.442695, %v261_v60 }
 0x2f0   :  { %v189_v62 = vpop.f32.mrf.mxu2 }
 0x2f1   :  { %v196_v63 = vadd.f32 %v1518_v61, %v189_v62 }
 0x2f2   :  { %v259_v0 = vpop.f32.mrf.mxu1 }
 0x2f3   :  { %v1241_v1 = vpop.eup %1240  ;;  %v210_v2 = vadd.f32 %v206_v54, %v196_v63  ;;  %v60_v54 = vld [vmem:[%s1740_s0 + $0x18] sm:$0xff] }
 0x2f4   :  { %284 = vrot.lane.b32.xlu2 %v1241_v1, %s1363_s23  ;;  %v66_v55 = vpack.c.bf16 %v60_v54, %v59_v53 }
 0x2f5   :  { %1242 = vtanh.f32 %v210_v2  ;;  %v1189_v7 = vmul.f32 -1.442695, %v210_v2 }
 0x2f6   :  { %1244 = vpow2.f32 %v1191_v6  ;;  %1184 = vmatmul.msk.bf16.gmra.mxu0 %vm72_vm1, %v66_v55 }
 0x2f7   :  { %1246 = vpow2.f32 %v1189_v7 }
 0x2f8   :  { %v191_v4 = vpop.f32.mrf.mxu2 }
 0x2fb   :  { %v1243_v5 = vpop.eup %1242 }
 0x2fc   :  { %233 = vrot.lane.b32.xlu2 %v1243_v5, %s1363_s23  ;;  %v1245_v8 = vpop.eup %1244 }
 0x2fd   :  { %v265_v9 = vadd.f32 1.0, %v1245_v8  ;;  %v1247_v10 = vpop.eup %1246 }
 0x2fe   :  { %v214_v12 = vadd.f32 1.0, %v1247_v10 }
 0x2ff   :  { %1248 = vrcp.f32 %v265_v9  ;;  %v277_v22 = vand.u32 2147483648, %v265_v9  ;;  %vm271_vm8 = vweird.f32 %v265_v9  ;;  %v275_v23 = vand.u32 2147483647, %v265_v9 }
 0x300   :  { %1250 = vrcp.f32 %v214_v12  ;;  %v226_v31 = vand.u32 2147483648, %v214_v12  ;;  %vm220_vm12 = vweird.f32 %v214_v12  ;;  %v224_v32 = vand.u32 2147483647, %v214_v12 }
 0x301   :  { %v278_v26 = vor.u32 1.1754944e-38, %v277_v22  ;;  %vm276_vm10 = vcmp.eq.f32.partialorder %v275_v23, 8.507059e+37 }
 0x302   :  { %v227_v34 = vor.u32 1.1754944e-38, %v226_v31  ;;  %vm225_vm14 = vcmp.eq.f32.partialorder %v224_v32, 8.507059e+37 }
 0x305   :  { %v1249_v14 = vpop.eup %1248 }
 0x306   :  { %v267_v15 = vmul.f32 %v1249_v14, %v265_v9  ;;  %v1251_v17 = vpop.eup %1250  ;;  %vm272_vm7 = vweird.f32 %v1249_v14 }
 0x307   :  { %v216_v19 = vmul.f32 %v1251_v17, %v214_v12  ;;  %vm273_vm9 = vmor %vm271_vm8, %vm272_vm7  ;;  %vm221_vm11 = vweird.f32 %v1251_v17 }
 0x308   :  { %v268_v16 = vsub.f32 1.0, %v267_v15  ;;  %vm222_vm13 = vmor %vm220_vm12, %vm221_vm11 }
 0x309   :  { %v217_v21 = vsub.f32 1.0, %v216_v19 }
 0x30a   :  { %v269_v18 = vmul.f32 %v1249_v14, %v268_v16 }
 0x30b   :  { %v218_v25 = vmul.f32 %v1251_v17, %v217_v21 }
 0x30c   :  { %v270_v20 = vadd.f32 %v1249_v14, %v269_v18 }
 0x30d   :  { %v219_v30 = vadd.f32 %v1251_v17, %v218_v25 }
 0x30e   :  { %v274_v24 = vsel %vm273_vm9, %v1249_v14, %v270_v20 }
 0x30f   :  { %v279_v28 = vsel %vm276_vm10, %v278_v26, %v274_v24  ;;  %v223_v33 = vsel %vm222_vm13, %v1251_v17, %v219_v30 }
 0x310   :  { %v228_v36 = vsel %vm225_vm14, %v227_v34, %v223_v33  ;;  %v282_v39 = vmul.f32 %v279_v28, %v1458_v37 }
 0x311   :  { %v231_v43 = vmul.f32 0.0, %v228_v36 }
 0x34e   :  { %v285_v27 = vpop.permute.xlu2 %284 }
 0x34f   :  { %v287_v29 = vmul.f32 %v285_v27, %v279_v28 }
 0x351   :  { %289 = vrot.lane.b32.xlu0 %v287_v29, %s1363_s23 }
 0x356   :  { %v234_v35 = vpop.permute.xlu2 %233 }
 0x357   :  { %v236_v38 = vmul.f32 %v234_v35, %v228_v36 }
 0x359   :  { %238 = vrot.lane.b32.xlu1 %v236_v38, %s1363_s23 }
 0x373   :  { %v103_v62 = vpop.f32.mrf.mxu0 }
 0x374   :  { %v104_v63 = vadd.f32 %v1453_v13, %v103_v62 }
 0x3c3   :  { %v290_v40 = vpop.permute.xlu0 %289 }
 0x3c4   :  { %v1526_v41 = vadd.f32 %v290_v40, %v282_v39 }
 0x3c6   :  { %1252 = vtanh.f32 %v1526_v41 }
 0x3cb   :  { %v239_v44 = vpop.permute.xlu1 %238 }
 0x3cc   :  { %v1253_v45 = vpop.eup %1252  ;;  %v1529_v47 = vadd.f32 %v239_v44, %v231_v43 }
 0x3cd   :  { %295 = vrot.lane.b32.xlu2 %v1253_v45, %s1363_s23 }
 0x3ce   :  { %1254 = vtanh.f32 %v1529_v47 }
 0x3d4   :  { %v1255_v48 = vpop.eup %1254 }
 0x3d5   :  { %244 = vrot.lane.b32.xlu0 %v1255_v48, %s1363_s23 }
 0x427   :  { %v296_v51 = vpop.permute.xlu2 %295 }
 0x428   :  { %v298_v52 = vmul.f32 %v296_v51, %v279_v28 }
 0x42a   :  { %v299_v37 = vpack.c.bf16 %v298_v52, %v298_v52 }
 0x42c   :  { %301 = vrot.lane.b32.xlu1 %v299_v37, %s1364_s4 }
 0x447   :  { %v245_v56 = vpop.permute.xlu0 %244 }
 0x448   :  { %v247_v57 = vmul.f32 %v245_v56, %v228_v36 }
 0x44a   :  { %v320_v58 = vpack.c.bf16 %v247_v57, %v247_v57 }
 0x44c   :  { %322 = vrot.lane.b32.xlu2 %v320_v58, %s1364_s4 }
 0x49e   :  { %v302_v59 = vpop.permute.xlu1 %301 }
 0x49f   :  { %1192 = vmatmul.msk.bf16.vlgmr.msrb.gmra.mxu2 %vm118_vm6, %v302_v59  ;;  %1195 = vmatmul.msk.bf16.vlgmr.msra.gmra.mxu1 %vm118_vm6, %v302_v59 }
 0x4a0   :  { %572 = vmatpush.bf16.msrb.mxu2 %v1482_v46  ;;  %702 = vmatpush.bf16.msra.mxu1 %v1482_v46 }
 0x4a4   :  { %573 = vmatpush.bf16.msrb.mxu2 %v1494_v50  ;;  %703 = vmatpush.bf16.msra.mxu1 %v1494_v50 }
 0x4a6   :  { %v323_v60 = vpop.permute.xlu2 %322 }
 0x4a7   :  { %1193 = vmatmul.msk.bf16.vlgmr.msrb.gmra.mxu3 %vm118_vm6, %v323_v60 }
 0x4a8   :  { %593 = vmatpush.bf16.msrb.mxu3 %v1471_v42 }
 0x4ac   :  { %594 = vmatpush.bf16.msrb.mxu3 %v1491_v49 }
 0x51c   :  { %v387_v0 = vpop.f32.mrf.mxu1 }
 0x51d   :  { %v391_v1 = vadd.f32 %v387_v0, %v104_v63 }
 0x51f   :  { %1256 = vtanh.f32 %v391_v1  ;;  %v1196_v14 = vmul.f32 -1.442695, %v391_v1  ;;  %v105_v1 = vpop.f32.mrf.mxu0 }
 0x522   :  { %v315_v2 = vpop.f32.mrf.mxu2 }
 0x523   :  { %v319_v6 = vadd.f32 %v1518_v61, %v315_v2  ;;  %v106_v2 = vadd.f32 %v1453_v13, %v105_v1 }
 0x524   :  { %v389_v4 = vpop.f32.mrf.mxu1 }
 0x525   :  { %v1257_v5 = vpop.eup %1256 }
 0x526   :  { %414 = vrot.lane.b32.xlu0 %v1257_v5, %s1363_s23 }
 0x52a   :  { %v317_v7 = vpop.f32.mrf.mxu2  ;;  %v336_v8 = vpop.f32.mrf.mxu3 }
 0x52b   :  { %v340_v9 = vadd.f32 %v336_v8, %v319_v6 }
 0x52d   :  { %1258 = vtanh.f32 %v340_v9  ;;  %v1194_v17 = vmul.f32 -1.442695, %v340_v9 }
 0x52e   :  { %1260 = vpow2.f32 %v1196_v14 }
 0x532   :  { %v338_v10 = vpop.f32.mrf.mxu3 }
 0x533   :  { %v1259_v12 = vpop.eup %1258 }
 0x534   :  { %363 = vrot.lane.b32.xlu1 %v1259_v12, %s1363_s23  ;;  %v1261_v15 = vpop.eup %1260 }
 0x535   :  { %v395_v16 = vadd.f32 1.0, %v1261_v15 }
 0x537   :  { %1262 = vrcp.f32 %v395_v16  ;;  %v407_v26 = vand.u32 2147483648, %v395_v16  ;;  %vm401_vm0 = vweird.f32 %v395_v16  ;;  %v405_v27 = vand.u32 2147483647, %v395_v16 }
 0x538   :  { %1264 = vpow2.f32 %v1194_v17 }
 0x539   :  { %v408_v30 = vor.u32 1.1754944e-38, %v407_v26  ;;  %vm406_vm3 = vcmp.eq.f32.partialorder %v405_v27, 8.507059e+37 }
 0x53d   :  { %v1263_v18 = vpop.eup %1262 }
 0x53e   :  { %v1265_v19 = vpop.eup %1264  ;;  %v397_v20 = vmul.f32 %v1263_v18, %v395_v16  ;;  %vm402_vm15 = vweird.f32 %v1263_v18 }
 0x53f   :  { %v344_v21 = vadd.f32 1.0, %v1265_v19  ;;  %vm403_vm2 = vmor %vm401_vm0, %vm402_vm15 }
 0x540   :  { %v398_v22 = vsub.f32 1.0, %v397_v20 }
 0x541   :  { %1266 = vrcp.f32 %v344_v21  ;;  %v356_v38 = vand.u32 2147483648, %v344_v21  ;;  %vm350_vm5 = vweird.f32 %v344_v21  ;;  %v354_v39 = vand.u32 2147483647, %v344_v21 }
 0x542   :  { %v399_v23 = vmul.f32 %v1263_v18, %v398_v22 }
 0x543   :  { %v357_v43 = vor.u32 1.1754944e-38, %v356_v38  ;;  %vm355_vm8 = vcmp.eq.f32.partialorder %v354_v39, 8.507059e+37 }
 0x544   :  { %v400_v25 = vadd.f32 %v1263_v18, %v399_v23 }
 0x546   :  { %v404_v29 = vsel %vm403_vm2, %v1263_v18, %v400_v25 }
 0x547   :  { %v1267_v24 = vpop.eup %1266  ;;  %v409_v32 = vsel %vm406_vm3, %v408_v30, %v404_v29 }
 0x548   :  { %v346_v28 = vmul.f32 %v1267_v24, %v344_v21  ;;  %vm351_vm4 = vweird.f32 %v1267_v24  ;;  %v412_v51 = vmul.f32 %v409_v32, %v1526_v41 }
 0x549   :  { %vm352_vm7 = vmor %vm350_vm5, %vm351_vm4 }
 0x54a   :  { %v347_v31 = vsub.f32 1.0, %v346_v28 }
 0x54c   :  { %v348_v35 = vmul.f32 %v1267_v24, %v347_v31 }
 0x54e   :  { %v349_v36 = vadd.f32 %v1267_v24, %v348_v35 }
 0x550   :  { %v353_v40 = vsel %vm352_vm7, %v1267_v24, %v349_v36 }
 0x551   :  { %v358_v45 = vsel %vm355_vm8, %v357_v43, %v353_v40 }
 0x552   :  { %v361_v54 = vmul.f32 %v358_v45, %v1529_v47 }
 0x598   :  { %v415_v33 = vpop.permute.xlu0 %414 }
 0x599   :  { %v417_v34 = vmul.f32 %v415_v33, %v409_v32 }
 0x59b   :  { %419 = vrot.lane.b32.xlu2 %v417_v34, %s1363_s23 }
 0x5a6   :  { %v364_v44 = vpop.permute.xlu1 %363 }
 0x5a7   :  { %v366_v48 = vmul.f32 %v364_v44, %v358_v45 }
 0x5a9   :  { %368 = vrot.lane.b32.xlu0 %v366_v48, %s1363_s23 }
 0x5f5   :  { %v420_v52 = vpop.permute.xlu2 %419 }
 0x5f6   :  { %v1559_v37 = vadd.f32 %v420_v52, %v412_v51 }
 0x5f8   :  { %1268 = vtanh.f32 %v1559_v37 }
 0x5fe   :  { %v1269_v53 = vpop.eup %1268 }
 0x5ff   :  { %425 = vrot.lane.b32.xlu1 %v1269_v53, %s1363_s23 }
 0x61b   :  { %v369_v55 = vpop.permute.xlu0 %368 }
 0x61c   :  { %v1564_v56 = vadd.f32 %v369_v55, %v361_v54 }
 0x61e   :  { %1270 = vtanh.f32 %v1564_v56 }
 0x624   :  { %v1271_v57 = vpop.eup %1270 }
 0x625   :  { %374 = vrot.lane.b32.xlu2 %v1271_v57, %s1363_s23 }
 0x671   :  { %v426_v58 = vpop.permute.xlu1 %425 }
 0x672   :  { %v428_v41 = vmul.f32 %v426_v58, %v409_v32 }
 0x674   :  { %v429_v59 = vpack.c.bf16 %v428_v41, %v428_v41 }
 0x676   :  { %431 = vrot.lane.b32.xlu0 %v429_v59, %s1364_s4 }
 0x67f   :  { %v375_v60 = vpop.permute.xlu2 %374 }
 0x680   :  { %v377_v62 = vmul.f32 %v375_v60, %v358_v45 }
 0x682   :  { %v450_v63 = vpack.c.bf16 %v377_v62, %v377_v62 }
 0x684   :  { %452 = vrot.lane.b32.xlu1 %v450_v63, %s1364_s4  ;;  %v62_v63 = vld [vmem:[%s1740_s0 + $0x28] sm:$0xff] }
 0x6e8   :  { %v432_v0 = vpop.permute.xlu0 %431 }
 0x6e9   :  { %1197 = vmatmul.msk.bf16.vlgmr.msra.gmra.mxu2 %vm118_vm6, %v432_v0  ;;  %1200 = vmatmul.msk.bf16.vlgmr.msrb.gmra.mxu1 %vm118_vm6, %v432_v0 }
 0x6ea   :  { %723 = vmatpush.bf16.msra.mxu2 %v1471_v42  ;;  %853 = vmatpush.bf16.msrb.mxu1 %v1471_v42 }
 0x6ee   :  { %724 = vmatpush.bf16.msra.mxu2 %v1491_v49  ;;  %854 = vmatpush.bf16.msrb.mxu1 %v1491_v49 }
 0x6f6   :  { %v453_v47 = vpop.permute.xlu1 %452 }
 0x6f7   :  { %1198 = vmatmul.msk.bf16.vlgmr.msra.gmra.mxu3 %vm118_vm6, %v453_v47 }
 0x6f8   :  { %774 = vmatpush.bf16.msra.mxu3 %v1424_v3 }
 0x6fc   :  { %775 = vmatpush.bf16.msra.mxu3 %v1439_v11 }
 0x766   :  { %v517_v4 = vpop.f32.mrf.mxu1 }
 0x767   :  { %v521_v5 = vadd.f32 %v517_v4, %v106_v2  ;;  %v63_v2 = vld [vmem:[%s1740_s0 + $0x30] sm:$0xff]  ;;  %v64_v4 = vld [vmem:[%s1740_s0 + $0x38] sm:$0xff] }
 0x769   :  { %1272 = vtanh.f32 %v521_v5  ;;  %v1201_v17 = vmul.f32 -1.442695, %v521_v5  ;;  %v68_v5 = vpack.c.bf16 %v64_v4, %v63_v2 }
 0x76c   :  { %v445_v6 = vpop.f32.mrf.mxu2 }
 0x76d   :  { %v449_v10 = vadd.f32 %v1518_v61, %v445_v6 }
 0x76e   :  { %v519_v7 = vpop.f32.mrf.mxu1 }
 0x76f   :  { %v1273_v8 = vpop.eup %1272 }
 0x770   :  { %544 = vrot.lane.b32.xlu2 %v1273_v8, %s1363_s23 }
 0x774   :  { %v447_v9 = vpop.f32.mrf.mxu2 }
 0x77a   :  { %v466_v12 = vpop.f32.mrf.mxu3 }
 0x77b   :  { %v470_v14 = vadd.f32 %v466_v12, %v449_v10 }
 0x77d   :  { %1274 = vtanh.f32 %v470_v14  ;;  %v1199_v29 = vmul.f32 -1.442695, %v470_v14 }
 0x77e   :  { %1276 = vpow2.f32 %v1201_v17 }
 0x782   :  { %v468_v15 = vpop.f32.mrf.mxu3 }
 0x783   :  { %v1275_v16 = vpop.eup %1274 }
 0x784   :  { %493 = vrot.lane.b32.xlu0 %v1275_v16, %s1363_s23  ;;  %v1277_v18 = vpop.eup %1276 }
 0x785   :  { %v525_v19 = vadd.f32 1.0, %v1277_v18 }
 0x787   :  { %1278 = vrcp.f32 %v525_v19  ;;  %v537_v25 = vand.u32 2147483648, %v525_v19  ;;  %vm531_vm10 = vweird.f32 %v525_v19  ;;  %v535_v26 = vand.u32 2147483647, %v525_v19 }
 0x788   :  { %1280 = vpow2.f32 %v1199_v29 }
 0x789   :  { %v538_v28 = vor.u32 1.1754944e-38, %v537_v25  ;;  %vm536_vm12 = vcmp.eq.f32.partialorder %v535_v26, 8.507059e+37 }
 0x78d   :  { %v1279_v20 = vpop.eup %1278 }
 0x78e   :  { %v527_v21 = vmul.f32 %v1279_v20, %v525_v19  ;;  %vm532_vm9 = vweird.f32 %v1279_v20  ;;  %v1281_v33 = vpop.eup %1280 }
 0x78f   :  { %vm533_vm11 = vmor %vm531_vm10, %vm532_vm9  ;;  %v474_v34 = vadd.f32 1.0, %v1281_v33 }
 0x790   :  { %v528_v22 = vsub.f32 1.0, %v527_v21 }
 0x791   :  { %1282 = vrcp.f32 %v474_v34  ;;  %v486_v43 = vand.u32 2147483648, %v474_v34  ;;  %vm480_vm14 = vweird.f32 %v474_v34  ;;  %v484_v44 = vand.u32 2147483647, %v474_v34 }
 0x792   :  { %v529_v23 = vmul.f32 %v1279_v20, %v528_v22 }
 0x793   :  { %v487_v48 = vor.u32 1.1754944e-38, %v486_v43  ;;  %vm485_vm0 = vcmp.eq.f32.partialorder %v484_v44, 8.507059e+37 }
 0x794   :  { %v530_v24 = vadd.f32 %v1279_v20, %v529_v23 }
 0x796   :  { %v534_v27 = vsel %vm533_vm11, %v1279_v20, %v530_v24 }
 0x797   :  { %v539_v30 = vsel %vm536_vm12, %v538_v28, %v534_v27  ;;  %v1283_v35 = vpop.eup %1282 }
 0x798   :  { %v476_v36 = vmul.f32 %v1283_v35, %v474_v34  ;;  %vm481_vm13 = vweird.f32 %v1283_v35  ;;  %v542_v54 = vmul.f32 %v539_v30, %v1559_v37  ;;  %v61_v37 = vld [vmem:[%s1740_s0 + $0x20] sm:$0xff] }
 0x799   :  { %vm482_vm15 = vmor %vm480_vm14, %vm481_vm13  ;;  %v67_v0 = vpack.c.bf16 %v62_v63, %v61_v37 }
 0x79a   :  { %v477_v38 = vsub.f32 1.0, %v476_v36 }
 0x79b   :  { %1185 = vmatmul.msk.bf16.gmra.mxu0 %vm72_vm1, %v67_v0 }
 0x79c   :  { %v478_v39 = vmul.f32 %v1283_v35, %v477_v38 }
 0x79e   :  { %v479_v40 = vadd.f32 %v1283_v35, %v478_v39 }
 0x7a0   :  { %v483_v45 = vsel %vm482_vm15, %v1283_v35, %v479_v40 }
 0x7a1   :  { %v488_v52 = vsel %vm485_vm0, %v487_v48, %v483_v45 }
 0x7a2   :  { %v491_v41 = vmul.f32 %v488_v52, %v1564_v56 }
 0x7ab   :  { %1186 = vmatmul.msk.bf16.gmra.mxu0 %vm72_vm1, %v68_v5 }
 0x7ca   :  { %v545_v31 = vpop.permute.xlu2 %544 }
 0x7cb   :  { %v547_v32 = vmul.f32 %v545_v31, %v539_v30 }
 0x7cd   :  { %549 = vrot.lane.b32.xlu1 %v547_v32, %s1363_s23 }
 0x7f6   :  { %v494_v51 = vpop.permute.xlu0 %493 }
 0x7f7   :  { %v496_v53 = vmul.f32 %v494_v51, %v488_v52 }
 0x7f9   :  { %498 = vrot.lane.b32.xlu2 %v496_v53, %s1363_s23 }
 0x818   :  { %v108_v12 = vpop.f32.mrf.mxu0 }
 0x819   :  { %v109_v17 = vadd.f32 %v1453_v13, %v108_v12 }
 0x820   :  { %v1620_v14 = vpop.f32.mrf.mxu0 }
 0x828   :  { %v1622_v15 = vpop.f32.mrf.mxu0 }
 0x830   :  { %v1624_v16 = vpop.f32.mrf.mxu0 }
 0x83f   :  { %v550_v55 = vpop.permute.xlu1 %549 }
 0x840   :  { %v1586_v57 = vadd.f32 %v550_v55, %v542_v54 }
 0x842   :  { %1284 = vtanh.f32 %v1586_v57 }
 0x848   :  { %v1285_v58 = vpop.eup %1284 }
 0x849   :  { %555 = vrot.lane.b32.xlu0 %v1285_v58, %s1363_s23 }
 0x853   :  { %v499_v59 = vpop.permute.xlu2 %498 }
 0x854   :  { %v1591_v60 = vadd.f32 %v499_v59, %v491_v41 }
 0x856   :  { %1286 = vtanh.f32 %v1591_v60 }
 0x85c   :  { %v1287_v62 = vpop.eup %1286 }
 0x85d   :  { %504 = vrot.lane.b32.xlu1 %v1287_v62, %s1363_s23 }
 0x8bb   :  { %v556_v56 = vpop.permute.xlu0 %555 }
 0x8bc   :  { %v558_v47 = vmul.f32 %v556_v56, %v539_v30 }
 0x8be   :  { %v559_v1 = vpack.c.bf16 %v558_v47, %v558_v47 }
 0x8c0   :  { %561 = vrot.lane.b32.xlu2 %v559_v1, %s1364_s4 }
 0x8cf   :  { %v505_v6 = vpop.permute.xlu1 %504 }
 0x8d0   :  { %v507_v7 = vmul.f32 %v505_v6, %v488_v52 }
 0x8d2   :  { %v580_v8 = vpack.c.bf16 %v507_v7, %v507_v7 }
 0x8d4   :  { %582 = vrot.lane.b32.xlu0 %v580_v8, %s1364_s4 }
 0x91a   :  { %v562_v9 = vpop.permute.xlu2 %561 }
 0x91b   :  { %1202 = vmatmul.msk.bf16.vlgmr.msrb.gmra.mxu2 %vm118_vm6, %v562_v9  ;;  %1205 = vmatmul.msk.bf16.vlgmr.msrb.gmra.mxu0 %vm118_vm6, %v562_v9 }
 0x91c   :  { %904 = vmatpush.bf16.msrb.mxu2 %v1424_v3  ;;  %983 = vmatpush.bf16.msrb.mxu0 %v1471_v42 }
 0x920   :  { %905 = vmatpush.bf16.msrb.mxu2 %v1439_v11  ;;  %984 = vmatpush.bf16.msrb.mxu0 %v1491_v49 }
 0x946   :  { %v583_v10 = vpop.permute.xlu0 %582 }
 0x947   :  { %1203 = vmatmul.msk.bf16.vlgmr.msrb.gmra.mxu3 %vm118_vm6, %v583_v10 }
 0x948   :  { %962 = vmatpush.bf16.msrb.mxu3 %v1482_v46 }
 0x94c   :  { %963 = vmatpush.bf16.msrb.mxu3 %v1494_v50 }
 0x998   :  { %v647_v18 = vpop.f32.mrf.mxu0 }
 0x999   :  { %v651_v19 = vadd.f32 %v647_v18, %v109_v17 }
 0x99b   :  { %1288 = vtanh.f32 %v651_v19  ;;  %v1206_v29 = vmul.f32 -1.442695, %v651_v19 }
 0x99e   :  { %v575_v20 = vpop.f32.mrf.mxu2 }
 0x99f   :  { %v579_v24 = vadd.f32 %v1518_v61, %v575_v20 }
 0x9a0   :  { %v649_v21 = vpop.f32.mrf.mxu0 }
 0x9a1   :  { %v1289_v22 = vpop.eup %1288 }
 0x9a2   :  { %674 = vrot.lane.b32.xlu1 %v1289_v22, %s1363_s23 }
 0x9a6   :  { %v577_v23 = vpop.f32.mrf.mxu2 }
 0x9a7   :  { %v111_v23 = vadd.f32 %v1453_v13, %v1620_v14 }
 0x9ca   :  { %v596_v25 = vpop.f32.mrf.mxu3 }
 0x9cb   :  { %v600_v26 = vadd.f32 %v596_v25, %v579_v24 }
 0x9cd   :  { %1290 = vtanh.f32 %v600_v26  ;;  %v1204_v33 = vmul.f32 -1.442695, %v600_v26 }
 0x9ce   :  { %1292 = vpow2.f32 %v1206_v29 }
 0x9d2   :  { %v598_v27 = vpop.f32.mrf.mxu3 }
 0x9d3   :  { %v1291_v28 = vpop.eup %1290 }
 0x9d4   :  { %623 = vrot.lane.b32.xlu2 %v1291_v28, %s1363_s23  ;;  %v1293_v30 = vpop.eup %1292 }
 0x9d5   :  { %v655_v31 = vadd.f32 1.0, %v1293_v30 }
 0x9d7   :  { %1294 = vrcp.f32 %v655_v31  ;;  %v667_v43 = vand.u32 2147483648, %v655_v31  ;;  %vm661_vm2 = vweird.f32 %v655_v31  ;;  %v665_v44 = vand.u32 2147483647, %v655_v31 }
 0x9d8   :  { %1296 = vpow2.f32 %v1204_v33 }
 0x9d9   :  { %v668_v48 = vor.u32 1.1754944e-38, %v667_v43  ;;  %vm666_vm4 = vcmp.eq.f32.partialorder %v665_v44, 8.507059e+37 }
 0x9dd   :  { %v1295_v32 = vpop.eup %1294 }
 0x9de   :  { %v657_v34 = vmul.f32 %v1295_v32, %v655_v31  ;;  %v1297_v38 = vpop.eup %1296  ;;  %vm662_vm1 = vweird.f32 %v1295_v32 }
 0x9df   :  { %v604_v40 = vadd.f32 1.0, %v1297_v38  ;;  %vm663_vm3 = vmor %vm661_vm2, %vm662_vm1 }
 0x9e0   :  { %v658_v35 = vsub.f32 1.0, %v657_v34 }
 0x9e1   :  { %1298 = vrcp.f32 %v604_v40  ;;  %v616_v62 = vand.u32 2147483648, %v604_v40  ;;  %vm610_vm7 = vweird.f32 %v604_v40  ;;  %v614_v37 = vand.u32 2147483647, %v604_v40 }
 0x9e2   :  { %v659_v36 = vmul.f32 %v1295_v32, %v658_v35 }
 0x9e3   :  { %v617_v0 = vor.u32 1.1754944e-38, %v616_v62  ;;  %vm615_vm9 = vcmp.eq.f32.partialorder %v614_v37, 8.507059e+37 }
 0x9e4   :  { %v660_v39 = vadd.f32 %v1295_v32, %v659_v36 }
 0x9e6   :  { %v664_v45 = vsel %vm663_vm3, %v1295_v32, %v660_v39 }
 0x9e7   :  { %v669_v51 = vsel %vm666_vm4, %v668_v48, %v664_v45  ;;  %v1299_v54 = vpop.eup %1298 }
 0x9e8   :  { %v606_v55 = vmul.f32 %v1299_v54, %v604_v40  ;;  %vm611_vm5 = vweird.f32 %v1299_v54  ;;  %v672_v2 = vmul.f32 %v669_v51, %v1586_v57 }
 0x9e9   :  { %vm612_vm8 = vmor %vm610_vm7, %vm611_vm5 }
 0x9ea   :  { %v607_v58 = vsub.f32 1.0, %v606_v55 }
 0x9ec   :  { %v608_v41 = vmul.f32 %v1299_v54, %v607_v58 }
 0x9ee   :  { %v609_v59 = vadd.f32 %v1299_v54, %v608_v41 }
 0x9f0   :  { %v613_v63 = vsel %vm612_vm8, %v1299_v54, %v609_v59 }
 0x9f1   :  { %v618_v47 = vsel %vm615_vm9, %v617_v0, %v613_v63 }
 0x9f2   :  { %v621_v7 = vmul.f32 %v618_v47, %v1591_v60 }
 0xa14   :  { %v675_v52 = vpop.permute.xlu1 %674 }
 0xa15   :  { %v677_v53 = vmul.f32 %v675_v52, %v669_v51 }
 0xa17   :  { %679 = vrot.lane.b32.xlu0 %v677_v53, %s1363_s23 }
 0xa2e   :  { %v624_v56 = vpop.permute.xlu2 %623 }
 0xa2f   :  { %v626_v1 = vmul.f32 %v624_v56, %v618_v47 }
 0xa31   :  { %628 = vrot.lane.b32.xlu1 %v626_v1, %s1363_s23 }
 0xa89   :  { %v680_v4 = vpop.permute.xlu0 %679 }
 0xa8a   :  { %v1633_v5 = vadd.f32 %v680_v4, %v672_v2 }
 0xa8c   :  { %1300 = vtanh.f32 %v1633_v5 }
 0xa92   :  { %v1301_v6 = vpop.eup %1300 }
 0xa93   :  { %685 = vrot.lane.b32.xlu2 %v1301_v6, %s1363_s23 }
 0xaa3   :  { %v629_v8 = vpop.permute.xlu1 %628 }
 0xaa4   :  { %v1638_v9 = vadd.f32 %v629_v8, %v621_v7 }
 0xaa6   :  { %1302 = vtanh.f32 %v1638_v9 }
 0xaac   :  { %v1303_v10 = vpop.eup %1302 }
 0xaad   :  { %634 = vrot.lane.b32.xlu0 %v1303_v10, %s1363_s23 }
 0xaed   :  { %v686_v12 = vpop.permute.xlu2 %685 }
 0xaee   :  { %v688_v57 = vmul.f32 %v686_v12, %v669_v51 }
 0xaf0   :  { %v689_v17 = vpack.c.bf16 %v688_v57, %v688_v57 }
 0xaf2   :  { %691 = vrot.lane.b32.xlu1 %v689_v17, %s1364_s4 }
 0xb1f   :  { %v635_v18 = vpop.permute.xlu0 %634 }
 0xb20   :  { %v637_v19 = vmul.f32 %v635_v18, %v618_v47 }
 0xb22   :  { %v710_v20 = vpack.c.bf16 %v637_v19, %v637_v19 }
 0xb24   :  { %712 = vrot.lane.b32.xlu2 %v710_v20, %s1364_s4 }
 0xb64   :  { %v692_v21 = vpop.permute.xlu1 %691 }
 0xb65   :  { %1207 = vmatmul.msk.bf16.vlgmr.msra.gmra.mxu1 %vm118_vm6, %v692_v21  ;;  %1210 = vmatmul.msk.bf16.vlgmr.msra.gmra.mxu3 %vm118_vm6, %v692_v21  ;;  %v1678_v21 = vld [vmem:[%s1741_s3] ss:$0 sm:$0xff] }
 0xb66   :  { %1034 = vmatpush.bf16.msra.mxu1 %v1424_v3  ;;  %1113 = vmatpush.bf16.msra.mxu3 %v1471_v42 }
 0xb6a   :  { %1035 = vmatpush.bf16.msra.mxu1 %v1439_v11  ;;  %1114 = vmatpush.bf16.msra.mxu3 %v1491_v49 }
 0xb7e   :  { %v713_v60 = vpop.permute.xlu2 %712 }
 0xb7f   :  { %1208 = vmatmul.msk.bf16.vlgmr.msra.gmra.mxu2 %vm118_vm6, %v713_v60  ;;  %v114_v60 = vadd.f32 %v1678_v21, %v1622_v15 }
 0xb80   :  { %1092 = vmatpush.bf16.msra.mxu2 %v1482_v46 }
 0xb84   :  { %1093 = vmatpush.bf16.msra.mxu2 %v1494_v50 }
 0xbe2   :  { %v705_v22 = vpop.f32.mrf.mxu1 }
 0xbe3   :  { %v709_v11 = vadd.f32 %v1518_v61, %v705_v22 }
 0xbe8   :  { %v777_v24 = vpop.f32.mrf.mxu3 }
 0xbe9   :  { %v781_v25 = vadd.f32 %v777_v24, %v111_v23 }
 0xbea   :  { %v707_v3 = vpop.f32.mrf.mxu1 }
 0xbeb   :  { %1304 = vtanh.f32 %v781_v25  ;;  %v1211_v50 = vmul.f32 -1.442695, %v781_v25 }
 0xbf0   :  { %v779_v42 = vpop.f32.mrf.mxu3 }
 0xbf1   :  { %v1305_v26 = vpop.eup %1304 }
 0xbf2   :  { %804 = vrot.lane.b32.xlu0 %v1305_v26, %s1363_s23 }
 0xc02   :  { %v726_v49 = vpop.f32.mrf.mxu2 }
 0xc03   :  { %v730_v27 = vadd.f32 %v726_v49, %v709_v11 }
 0xc05   :  { %1306 = vtanh.f32 %v730_v27  ;;  %v1209_v30 = vmul.f32 -1.442695, %v730_v27 }
 0xc06   :  { %1308 = vpow2.f32 %v1211_v50 }
 0xc0a   :  { %v728_v46 = vpop.f32.mrf.mxu2 }
 0xc0b   :  { %v1307_v28 = vpop.eup %1306 }
 0xc0c   :  { %753 = vrot.lane.b32.xlu1 %v1307_v28, %s1363_s23  ;;  %v1309_v13 = vpop.eup %1308 }
 0xc0d   :  { %v785_v14 = vadd.f32 1.0, %v1309_v13 }
 0xc0f   :  { %1310 = vrcp.f32 %v785_v14  ;;  %v797_v38 = vand.u32 2147483648, %v785_v14  ;;  %vm791_vm11 = vweird.f32 %v785_v14  ;;  %v795_v39 = vand.u32 2147483647, %v785_v14 }
 0xc10   :  { %1312 = vpow2.f32 %v1209_v30 }
 0xc11   :  { %v798_v43 = vor.u32 1.1754944e-38, %v797_v38  ;;  %vm796_vm13 = vcmp.eq.f32.partialorder %v795_v39, 8.507059e+37 }
 0xc15   :  { %v1311_v29 = vpop.eup %1310 }
 0xc16   :  { %v787_v31 = vmul.f32 %v1311_v29, %v785_v14  ;;  %v1313_v34 = vpop.eup %1312  ;;  %vm792_vm10 = vweird.f32 %v1311_v29 }
 0xc17   :  { %v734_v36 = vadd.f32 1.0, %v1313_v34  ;;  %vm793_vm12 = vmor %vm791_vm11, %vm792_vm10 }
 0xc18   :  { %v788_v32 = vsub.f32 1.0, %v787_v31 }
 0xc19   :  { %1314 = vrcp.f32 %v734_v36  ;;  %v746_v58 = vand.u32 2147483648, %v734_v36  ;;  %vm740_vm15 = vweird.f32 %v734_v36  ;;  %v744_v41 = vand.u32 2147483647, %v734_v36 }
 0xc1a   :  { %v789_v33 = vmul.f32 %v1311_v29, %v788_v32 }
 0xc1b   :  { %v747_v62 = vor.u32 1.1754944e-38, %v746_v58  ;;  %vm745_vm1 = vcmp.eq.f32.partialorder %v744_v41, 8.507059e+37 }
 0xc1c   :  { %v790_v35 = vadd.f32 %v1311_v29, %v789_v33 }
 0xc1e   :  { %v794_v40 = vsel %vm793_vm12, %v1311_v29, %v790_v35 }
 0xc1f   :  { %v799_v44 = vsel %vm796_vm13, %v798_v43, %v794_v40  ;;  %v1315_v51 = vpop.eup %1314 }
 0xc20   :  { %v736_v52 = vmul.f32 %v1315_v51, %v734_v36  ;;  %vm741_vm14 = vweird.f32 %v1315_v51  ;;  %v802_v56 = vmul.f32 %v799_v44, %v1633_v5 }
 0xc21   :  { %vm742_vm0 = vmor %vm740_vm15, %vm741_vm14 }
 0xc22   :  { %v737_v53 = vsub.f32 1.0, %v736_v52 }
 0xc24   :  { %v738_v54 = vmul.f32 %v1315_v51, %v737_v53 }
 0xc26   :  { %v739_v55 = vadd.f32 %v1315_v51, %v738_v54 }
 0xc28   :  { %v743_v59 = vsel %vm742_vm0, %v1315_v51, %v739_v55 }
 0xc29   :  { %v748_v63 = vsel %vm745_vm1, %v747_v62, %v743_v59 }
 0xc2a   :  { %v751_v4 = vmul.f32 %v748_v63, %v1638_v9 }
 0xc64   :  { %v805_v45 = vpop.permute.xlu0 %804 }
 0xc65   :  { %v807_v48 = vmul.f32 %v805_v45, %v799_v44 }
 0xc67   :  { %809 = vrot.lane.b32.xlu2 %v807_v48, %s1363_s23 }
 0xc7e   :  { %v754_v37 = vpop.permute.xlu1 %753 }
 0xc7f   :  { %v756_v0 = vmul.f32 %v754_v37, %v748_v63 }
 0xc81   :  { %758 = vrot.lane.b32.xlu0 %v756_v0, %s1363_s23 }
 0xcc1   :  { %v810_v47 = vpop.permute.xlu2 %809 }
 0xcc2   :  { %v1661_v1 = vadd.f32 %v810_v47, %v802_v56 }
 0xcc4   :  { %1316 = vtanh.f32 %v1661_v1 }
 0xcca   :  { %v1317_v2 = vpop.eup %1316 }
 0xccb   :  { %815 = vrot.lane.b32.xlu1 %v1317_v2, %s1363_s23 }
 0xcf3   :  { %v759_v6 = vpop.permute.xlu0 %758 }
 0xcf4   :  { %v1666_v7 = vadd.f32 %v759_v6, %v751_v4 }
 0xcf6   :  { %1318 = vtanh.f32 %v1666_v7 }
 0xcfc   :  { %v1319_v8 = vpop.eup %1318 }
 0xcfd   :  { %764 = vrot.lane.b32.xlu2 %v1319_v8, %s1363_s23 }
 0xd3d   :  { %v816_v10 = vpop.permute.xlu1 %815 }
 0xd3e   :  { %v818_v5 = vmul.f32 %v816_v10, %v799_v44 }
 0xd40   :  { %v819_v12 = vpack.c.bf16 %v818_v5, %v818_v5 }
 0xd42   :  { %821 = vrot.lane.b32.xlu0 %v819_v12, %s1364_s4 }
 0xd57   :  { %v765_v57 = vpop.permute.xlu2 %764 }
 0xd58   :  { %v767_v17 = vmul.f32 %v765_v57, %v748_v63 }
 0xd5a   :  { %v840_v18 = vpack.c.bf16 %v767_v17, %v767_v17  ;;  %v116_v17 = vadd.f32 %v1678_v21, %v1624_v16 }
 0xd5c   :  { %842 = vrot.lane.b32.xlu1 %v840_v18, %s1364_s4 }
 0xdb4   :  { %v822_v19 = vpop.permute.xlu0 %821 }
 0xdb5   :  { %1212 = vmatmul.msk.bf16.vlgmr.msra.gmra.mxu0 %vm118_vm6, %v822_v19  ;;  %1215 = vmatmul.msk.bf16.vlgmr.msrb.gmra.mxu2 %vm118_vm6, %v822_v19 }
 0xdce   :  { %v843_v9 = vpop.permute.xlu1 %842 }
 0xdcf   :  { %1213 = vmatmul.msk.bf16.vlgmr.msrb.gmra.mxu1 %vm118_vm6, %v843_v9 }
 0xe32   :  { %v835_v20 = vpop.f32.mrf.mxu0 }
 0xe33   :  { %v839_v42 = vadd.f32 %v1518_v61, %v835_v20 }
 0xe38   :  { %v907_v22 = vpop.f32.mrf.mxu2 }
 0xe39   :  { %v911_v23 = vadd.f32 %v907_v22, %v114_v60 }
 0xe3a   :  { %v837_v24 = vpop.f32.mrf.mxu0 }
 0xe3b   :  { %1320 = vtanh.f32 %v911_v23  ;;  %v1216_v46 = vmul.f32 -1.442695, %v911_v23  ;;  %v1708_v23 = vld [vmem:[%s1744_s6] ss:$0 sm:$0xff] }
 0xe40   :  { %v909_v25 = vpop.f32.mrf.mxu2 }
 0xe41   :  { %v1321_v3 = vpop.eup %1320 }
 0xe42   :  { %934 = vrot.lane.b32.xlu2 %v1321_v3, %s1363_s23 }
 0xe4c   :  { %v856_v26 = vpop.f32.mrf.mxu1 }
 0xe4d   :  { %v860_v11 = vadd.f32 %v856_v26, %v839_v42 }
 0xe4f   :  { %1322 = vtanh.f32 %v860_v11  ;;  %v1214_v34 = vmul.f32 -1.442695, %v860_v11 }
 0xe50   :  { %1324 = vpow2.f32 %v1216_v46 }
 0xe54   :  { %v858_v49 = vpop.f32.mrf.mxu1 }
 0xe55   :  { %v1323_v27 = vpop.eup %1322 }
 0xe56   :  { %883 = vrot.lane.b32.xlu0 %v1323_v27, %s1363_s23  ;;  %v1325_v15 = vpop.eup %1324 }
 0xe57   :  { %v915_v28 = vadd.f32 1.0, %v1325_v15 }
 0xe59   :  { %1326 = vrcp.f32 %v915_v28  ;;  %v927_v31 = vand.u32 2147483648, %v915_v28  ;;  %vm921_vm3 = vweird.f32 %v915_v28  ;;  %v925_v61 = vand.u32 2147483647, %v915_v28 }
 0xe5a   :  { %1328 = vpow2.f32 %v1214_v34 }
 0xe5b   :  { %v928_v33 = vor.u32 1.1754944e-38, %v927_v31  ;;  %vm926_vm5 = vcmp.eq.f32.partialorder %v925_v61, 8.507059e+37 }
 0xe5f   :  { %v1327_v50 = vpop.eup %1326 }
 0xe60   :  { %v917_v13 = vmul.f32 %v1327_v50, %v915_v28  ;;  %vm922_vm2 = vweird.f32 %v1327_v50  ;;  %v1329_v39 = vpop.eup %1328 }
 0xe61   :  { %vm923_vm4 = vmor %vm921_vm3, %vm922_vm2  ;;  %v864_v40 = vadd.f32 1.0, %v1329_v39 }
 0xe62   :  { %v918_v14 = vsub.f32 1.0, %v917_v13 }
 0xe63   :  { %1330 = vrcp.f32 %v864_v40  ;;  %v876_v52 = vand.u32 2147483648, %v864_v40  ;;  %vm870_vm8 = vweird.f32 %v864_v40  ;;  %v874_v53 = vand.u32 2147483647, %v864_v40 }
 0xe64   :  { %v919_v29 = vmul.f32 %v1327_v50, %v918_v14 }
 0xe65   :  { %v877_v55 = vor.u32 1.1754944e-38, %v876_v52  ;;  %vm875_vm10 = vcmp.eq.f32.partialorder %v874_v53, 8.507059e+37 }
 0xe66   :  { %v920_v30 = vadd.f32 %v1327_v50, %v919_v29 }
 0xe68   :  { %v924_v32 = vsel %vm923_vm4, %v1327_v50, %v920_v30 }
 0xe69   :  { %v929_v36 = vsel %vm926_vm5, %v928_v33, %v924_v32  ;;  %v1331_v43 = vpop.eup %1330 }
 0xe6a   :  { %v866_v44 = vmul.f32 %v1331_v43, %v864_v40  ;;  %vm871_vm7 = vweird.f32 %v1331_v43  ;;  %v932_v62 = vmul.f32 %v929_v36, %v1661_v1 }
 0xe6b   :  { %vm872_vm9 = vmor %vm870_vm8, %vm871_vm7  ;;  %vm1177_vm8 = vcmask 7168  }
 0xe6c   :  { %v867_v45 = vsub.f32 1.0, %v866_v44 }
 0xe6e   :  { %v868_v48 = vmul.f32 %v1331_v43, %v867_v45 }
 0xe70   :  { %v869_v51 = vadd.f32 %v1331_v43, %v868_v48 }
 0xe72   :  { %v873_v54 = vsel %vm872_vm9, %v1331_v43, %v869_v51 }
 0xe73   :  { %v878_v41 = vsel %vm875_vm10, %v877_v55, %v873_v54 }
 0xe74   :  { %v881_v56 = vmul.f32 %v878_v41, %v1666_v7 }
 0xe9c   :  { %v935_v35 = vpop.permute.xlu2 %934 }
 0xe9d   :  { %v937_v38 = vmul.f32 %v935_v35, %v929_v36 }
 0xe9f   :  { %939 = vrot.lane.b32.xlu1 %v937_v38, %s1363_s23 }
 0xec8   :  { %v884_v58 = vpop.permute.xlu0 %883 }
 0xec9   :  { %v886_v59 = vmul.f32 %v884_v58, %v878_v41 }
 0xecb   :  { %888 = vrot.lane.b32.xlu2 %v886_v59, %s1363_s23 }
 0xf11   :  { %v940_v37 = vpop.permute.xlu1 %939 }
 0xf12   :  { %v1688_v63 = vadd.f32 %v940_v37, %v932_v62 }
 0xf14   :  { %1332 = vtanh.f32 %v1688_v63 }
 0xf1a   :  { %v1333_v0 = vpop.eup %1332 }
 0xf1b   :  { %945 = vrot.lane.b32.xlu0 %v1333_v0, %s1363_s23 }
 0xf25   :  { %v889_v47 = vpop.permute.xlu2 %888 }
 0xf26   :  { %v1693_v2 = vadd.f32 %v889_v47, %v881_v56 }
 0xf28   :  { %1334 = vtanh.f32 %v1693_v2 }
 0xf2e   :  { %v1335_v4 = vpop.eup %1334 }
 0xf2f   :  { %894 = vrot.lane.b32.xlu1 %v1335_v4, %s1363_s23 }
 0xf8d   :  { %v946_v6 = vpop.permute.xlu0 %945 }
 0xf8e   :  { %v948_v1 = vmul.f32 %v946_v6, %v929_v36 }
 0xf90   :  { %v949_v8 = vpack.c.bf16 %v948_v1, %v948_v1 }
 0xf92   :  { %951 = vrot.lane.b32.xlu2 %v949_v8, %s1364_s4 }
 0xfa1   :  { %v895_v10 = vpop.permute.xlu1 %894 }
 0xfa2   :  { %v897_v5 = vmul.f32 %v895_v10, %v878_v41 }
 0xfa4   :  { %v970_v12 = vpack.c.bf16 %v897_v5, %v897_v5 }
 0xfa6   :  { %972 = vrot.lane.b32.xlu0 %v970_v12, %s1364_s4 }
 0xfec   :  { %v952_v57 = vpop.permute.xlu2 %951 }
 0xfed   :  { %1217 = vmatmul.msk.bf16.vlgmr.msrb.gmra.mxu3 %vm118_vm6, %v952_v57  ;;  %1220 = vmatmul.msk.bf16.vlgmr.msra.gmra.mxu1 %vm118_vm6, %v952_v57 }
0x1018   :  { %v973_v7 = vpop.permute.xlu0 %972 }
0x1019   :  { %1218 = vmatmul.msk.bf16.vlgmr.msrb.gmra.mxu0 %vm118_vm6, %v973_v7 }
0x106a   :  { %v1037_v18 = vpop.f32.mrf.mxu1 }
0x106b   :  { %v1041_v19 = vadd.f32 %v1037_v18, %v116_v17 }
0x106d   :  { %1336 = vtanh.f32 %v1041_v19  ;;  %v1221_v42 = vmul.f32 -1.442695, %v1041_v19 }
0x1070   :  { %v965_v9 = vpop.f32.mrf.mxu3 }
0x1071   :  { %v969_v24 = vadd.f32 %v1708_v23, %v965_v9 }
0x1072   :  { %v1039_v20 = vpop.f32.mrf.mxu1 }
0x1073   :  { %v1337_v60 = vpop.eup %1336 }
0x1074   :  { %1064 = vrot.lane.b32.xlu1 %v1337_v60, %s1363_s23  ;;  %v1230_v60 = vld [vmem:[%s1745_s7] ss:$0 sm:$0xff] }
0x1078   :  { %v967_v22 = vpop.f32.mrf.mxu3 }
0x1096   :  { %v986_v25 = vpop.f32.mrf.mxu0 }
0x1097   :  { %v990_v3 = vadd.f32 %v986_v25, %v969_v24 }
0x1099   :  { %1338 = vtanh.f32 %v990_v3  ;;  %v1219_v49 = vmul.f32 -1.442695, %v990_v3 }
0x109a   :  { %1340 = vpow2.f32 %v1221_v42 }
0x109e   :  { %v988_v16 = vpop.f32.mrf.mxu0 }
0x109f   :  { %v1339_v21 = vpop.eup %1338 }
0x10a0   :  { %1013 = vrot.lane.b32.xlu2 %v1339_v21, %s1363_s23  ;;  %v1341_v26 = vpop.eup %1340 }
0x10a1   :  { %v1045_v11 = vadd.f32 1.0, %v1341_v26 }
0x10a3   :  { %1342 = vrcp.f32 %v1045_v11  ;;  %v1057_v29 = vand.u32 2147483648, %v1045_v11  ;;  %vm1051_vm12 = vweird.f32 %v1045_v11  ;;  %v1055_v30 = vand.u32 2147483647, %v1045_v11 }
0x10a4   :  { %1344 = vpow2.f32 %v1219_v49 }
0x10a5   :  { %v1058_v32 = vor.u32 1.1754944e-38, %v1057_v29  ;;  %vm1056_vm14 = vcmp.eq.f32.partialorder %v1055_v30, 8.507059e+37 }
0x10a9   :  { %v1343_v27 = vpop.eup %1342 }
0x10aa   :  { %v1047_v46 = vmul.f32 %v1343_v27, %v1045_v11  ;;  %v1345_v15 = vpop.eup %1344  ;;  %vm1052_vm11 = vweird.f32 %v1343_v27 }
0x10ab   :  { %v994_v50 = vadd.f32 1.0, %v1345_v15  ;;  %vm1053_vm13 = vmor %vm1051_vm12, %vm1052_vm11 }
0x10ac   :  { %v1048_v28 = vsub.f32 1.0, %v1047_v46 }
0x10ad   :  { %1346 = vrcp.f32 %v994_v50  ;;  %v1006_v43 = vand.u32 2147483648, %v994_v50  ;;  %vm1000_vm0 = vweird.f32 %v994_v50  ;;  %v1004_v44 = vand.u32 2147483647, %v994_v50 }
0x10ae   :  { %v1049_v13 = vmul.f32 %v1343_v27, %v1048_v28 }
0x10af   :  { %v1007_v48 = vor.u32 1.1754944e-38, %v1006_v43  ;;  %vm1005_vm2 = vcmp.eq.f32.partialorder %v1004_v44, 8.507059e+37 }
0x10b0   :  { %v1050_v14 = vadd.f32 %v1343_v27, %v1049_v13 }
0x10b2   :  { %v1054_v31 = vsel %vm1053_vm13, %v1343_v27, %v1050_v14 }
0x10b3   :  { %v1347_v61 = vpop.eup %1346  ;;  %v1059_v34 = vsel %vm1056_vm14, %v1058_v32, %v1054_v31  ;;  %v14_v31 = vstv %s1746_s8 }
0x10b4   :  { %v996_v36 = vmul.f32 %v1347_v61, %v994_v50  ;;  %vm1001_vm15 = vweird.f32 %v1347_v61  ;;  %v1062_v54 = vmul.f32 %v1059_v34, %v1688_v63  ;;  %15 = vst [vmem:[#allocation2] sm:$0x1] %v14_v31 }
0x10b5   :  { %vm1002_vm1 = vmor %vm1000_vm0, %vm1001_vm15 }
0x10b6   :  { %v997_v38 = vsub.f32 1.0, %v996_v36 }
0x10b8   :  { %v998_v39 = vmul.f32 %v1347_v61, %v997_v38 }
0x10ba   :  { %v999_v40 = vadd.f32 %v1347_v61, %v998_v39 }
0x10bc   :  { %v1003_v45 = vsel %vm1002_vm1, %v1347_v61, %v999_v40 }
0x10bd   :  { %v1008_v52 = vsel %vm1005_vm2, %v1007_v48, %v1003_v45 }
0x10be   :  { %v1011_v59 = vmul.f32 %v1008_v52, %v1693_v2 }
0x10e6   :  { %v1065_v33 = vpop.permute.xlu1 %1064 }
0x10e7   :  { %v1067_v35 = vmul.f32 %v1065_v33, %v1059_v34  ;;  %v1231_v33 = vld [vmem:[#allocation2] ss:$0 sm:$0xff] }
0x10e9   :  { %1069 = vrot.lane.b32.xlu0 %v1067_v35, %s1363_s23 }
0x10fa   :  { %v1014_v51 = vpop.permute.xlu2 %1013 }
0x10fb   :  { %v1016_v53 = vmul.f32 %v1014_v51, %v1008_v52 }
0x10fd   :  { %1018 = vrot.lane.b32.xlu1 %v1016_v53, %s1363_s23 }
0x115b   :  { %v1070_v55 = vpop.permute.xlu0 %1069 }
0x115c   :  { %v1072_v58 = vadd.f32 %v1070_v55, %v1062_v54 }
0x115e   :  { %1348 = vtanh.f32 %v1072_v58 }
0x1164   :  { %v1349_v41 = vpop.eup %1348 }
0x1165   :  { %1075 = vrot.lane.b32.xlu2 %v1349_v41, %s1363_s23 }
0x116f   :  { %v1019_v62 = vpop.permute.xlu1 %1018 }
0x1170   :  { %v1021_v37 = vadd.f32 %v1019_v62, %v1011_v59 }
0x1172   :  { %1350 = vtanh.f32 %v1021_v37 }
0x1178   :  { %v1351_v0 = vpop.eup %1350 }
0x1179   :  { %1024 = vrot.lane.b32.xlu0 %v1351_v0, %s1363_s23 }
0x11bf   :  { %v1076_v56 = vpop.permute.xlu2 %1075 }
0x11c0   :  { %v1078_v47 = vmul.f32 %v1076_v56, %v1059_v34 }
0x11c2   :  { %v1079_v4 = vpack.c.bf16 %v1078_v47, %v1078_v47 }
0x11c4   :  { %1081 = vrot.lane.b32.xlu1 %v1079_v4, %s1364_s4 }
0x11eb   :  { %v1025_v63 = vpop.permute.xlu0 %1024 }
0x11ec   :  { %v1027_v6 = vmul.f32 %v1025_v63, %v1008_v52 }
0x11ee   :  { %v1100_v1 = vpack.c.bf16 %v1027_v6, %v1027_v6 }
0x11f0   :  { %1102 = vrot.lane.b32.xlu2 %v1100_v1, %s1364_s4 }
0x1236   :  { %v1082_v8 = vpop.permute.xlu1 %1081 }
0x1237   :  { %1222 = vmatmul.msk.bf16.vlgmr.msra.gmra.mxu2 %vm118_vm6, %v1082_v8 }
0x124a   :  { %v1103_v2 = vpop.permute.xlu2 %1102 }
0x124b   :  { %1223 = vmatmul.msk.bf16.vlgmr.msra.gmra.mxu3 %vm118_vm6, %v1103_v2 }
0x12ba   :  { %v1095_v10 = vpop.f32.mrf.mxu2 }
0x12bb   :  { %v1099_v12 = vadd.f32 %v1708_v23, %v1095_v10 }
0x12c2   :  { %v1097_v5 = vpop.f32.mrf.mxu2 }
0x12ce   :  { %v1116_v57 = vpop.f32.mrf.mxu3 }
0x12cf   :  { %v1120_v7 = vadd.f32 %v1116_v57, %v1099_v12 }
0x12d1   :  { %1352 = vtanh.f32 %v1120_v7  ;;  %v1224_v19 = vmul.f32 -1.442695, %v1120_v7 }
0x12d3   :  { %1354 = vpow2.f32 %v1224_v19 }
0x12d6   :  { %v1118_v17 = vpop.f32.mrf.mxu3 }
0x12d7   :  { %v1353_v18 = vpop.eup %1352 }
0x12d8   :  { %1143 = vrot.lane.b32.xlu0 %v1353_v18, %s1363_s23 }
0x12d9   :  { %v1355_v9 = vpop.eup %1354 }
0x12da   :  { %v1124_v20 = vadd.f32 1.0, %v1355_v9 }
0x12dc   :  { %1356 = vrcp.f32 %v1124_v20  ;;  %v1136_v16 = vand.u32 2147483648, %v1124_v20  ;;  %vm1130_vm4 = vweird.f32 %v1124_v20  ;;  %v1134_v21 = vand.u32 2147483647, %v1124_v20 }
0x12de   :  { %v1137_v26 = vor.u32 1.1754944e-38, %v1136_v16  ;;  %vm1135_vm7 = vcmp.eq.f32.partialorder %v1134_v21, 8.507059e+37 }
0x12e0   :  { %1161 = vrot.lane.b32.xlu0 %v1230_v60, %s1364_s4 }
0x12e2   :  { %v1357_v22 = vpop.eup %1356 }
0x12e3   :  { %v1126_v23 = vmul.f32 %v1357_v22, %v1124_v20  ;;  %vm1131_vm3 = vweird.f32 %v1357_v22 }
0x12e4   :  { %vm1132_vm5 = vmor %vm1130_vm4, %vm1131_vm3 }
0x12e5   :  { %v1127_v24 = vsub.f32 1.0, %v1126_v23 }
0x12e7   :  { %v1128_v25 = vmul.f32 %v1357_v22, %v1127_v24 }
0x12e9   :  { %v1129_v3 = vadd.f32 %v1357_v22, %v1128_v25 }
0x12eb   :  { %v1133_v42 = vsel %vm1132_vm5, %v1357_v22, %v1129_v3 }
0x12ec   :  { %v1138_v49 = vsel %vm1135_vm7, %v1137_v26, %v1133_v42 }
0x12ed   :  { %v1141_v46 = vmul.f32 %v1138_v49, %v1021_v37 }
0x134a   :  { %v1144_v11 = vpop.permute.xlu0 %1143 }
0x134b   :  { %v1146_v27 = vmul.f32 %v1144_v11, %v1138_v49 }
0x134d   :  { %1148 = vrot.lane.b32.xlu1 %v1146_v27, %s1363_s23 }
0x1352   :  { %v1162_v14 = vpop.permute.xlu0 %1161 }
0x13bf   :  { %v1149_v15 = vpop.permute.xlu1 %1148 }
0x13c0   :  { %v1151_v28 = vadd.f32 %v1149_v15, %v1141_v46 }
0x13c2   :  { %1358 = vtanh.f32 %v1151_v28 }
0x13c8   :  { %v1359_v50 = vpop.eup %1358 }
0x13c9   :  { %1154 = vrot.lane.b32.xlu2 %v1359_v50, %s1363_s23 }
0x1423   :  { %v1155_v13 = vpop.permute.xlu2 %1154 }
0x1424   :  { %v1157_v29 = vmul.f32 %v1155_v13, %v1138_v49 }
0x1426   :  { %v1164_v30 = vmul.f32 %v1162_v14, %v1157_v29 }
0x1428   :  { %1166 = vrot.lane.b32.xlu1 %v1164_v30, %s1364_s4 }
0x149a   :  { %v1167_v61 = vpop.permute.xlu1 %1166 }
0x149b   :  { %v1169_v32 = vsel %vm118_vm6, %v1167_v61, 0.0 }
0x149c   :  { %1170 = vadd.xlane.f32.xlu2 %v1169_v32 }
0x150f   :  { %v1171_v34 = vpop.xlane.xlu2 %1170 }
0x1510   :  { %v1176_v35 = vadd.f32 %v1231_v33, %v1171_v34 }
0x1512   :  { %1178 = vst.msk [vmem:[%s1747_s9] sm:$0xff] %vm1177_vm8, %v1176_v35 }

</bundles_post_ra>
